<compile_context>
chip_gen: v7x
topology: tpu7x:2x2x1
jax: 0.10.0
libtpu: 0.0.40
codegen_flags: <defaults>
</compile_context>

<pallas_src>
import functools
from math import sqrt

import numpy as np
import jax
import jax.numpy as jnp
from jax import lax
from jax.experimental import pallas as pl
from jax.experimental.pallas import tpu as pltpu


# ----------------------------- tap orderings --------------------------------
# 3x3 taps first so a 3x3 conv reuses the leading 9 entries of the 5x5 order.
TAPS3 = [(dy, dx) for dy in (-1, 0, 1) for dx in (-1, 0, 1)]
TAPS5 = TAPS3 + [(dy, dx) for dy in (-2, -1, 0, 1, 2)
                 for dx in (-2, -1, 0, 1, 2)
                 if not (abs(dy) <= 1 and abs(dx) <= 1)]


def _tap_masks(H, W, C, N, taps):
    """(T, C, N) 0/1 masks: zero where tap (dy,dx) reads outside the HxW image."""
    nb = N // (H * W)
    M = np.zeros((len(taps), C, N), np.float32)
    for t, (dy, dx) in enumerate(taps):
        for b in range(nb):
            for i in range(H):
                for j in range(W):
                    if 0 <= i + dy < H and 0 <= j + dx < W:
                        M[t, :, b * H * W + i * W + j] = 1.0
    return jnp.asarray(M)


def _flat_w(w, taps, off):
    """HWIO weight -> (Cout, T*Cin) in `taps` order (off-kernel taps -> zeros)."""
    KH, KW, Cin, Cout = w.shape
    blocks = []
    for (dy, dx) in taps:
        hh, ww = dy + off, dx + off
        if 0 <= hh < KH and 0 <= ww < KW:
            blocks.append(w[hh, ww])                       # (Cin, Cout)
        else:
            blocks.append(jnp.zeros((Cin, Cout), w.dtype))
    Wf = jnp.stack(blocks, axis=0)                         # (T, Cin, Cout)
    return Wf.transpose(2, 0, 1).reshape(Cout, len(taps) * Cin)


def _stack_w_bias(convs, taps, kpad):
    """Stack [(w,b), off] conv weights to (sum Cout, kpad) bf16 with the bias
    folded in as an extra K column at index T*Cin (matching the ones row of the
    patch matrices); remaining K columns are zero padding."""
    rows = []
    for (w, b), off in convs:
        wf = _flat_w(w, taps, off)                         # (Cout, T*Cin)
        rows.append(jnp.concatenate([wf, b[:, None]], axis=1))
    W = jnp.concatenate(rows, axis=0)                      # (M, T*Cin + 1)
    return jnp.pad(W, ((0, 0), (0, kpad - W.shape[1]))).astype(jnp.bfloat16)


def _im2col_stride2(x, Ho, Wo, taps):
    """(B,H,W,Cin) -> (T*Cin, B*Ho*Wo) patches of the 5x5/stride-2/pad-2 window."""
    B, H, W, Cin = x.shape
    xp = jnp.pad(x, ((0, 0), (2, 2), (2, 2), (0, 0)))
    blocks = []
    for (dy, dx) in taps:
        h0, w0 = dy + 2, dx + 2
        blocks.append(xp[:, h0:h0 + 2 * Ho:2, w0:w0 + 2 * Wo:2, :])
    P = jnp.stack(blocks, axis=0).reshape(len(taps), B * Ho * Wo, Cin)
    return P.transpose(0, 2, 1).reshape(len(taps) * Cin, B * Ho * Wo)


# ------------------------------ fused kernel ---------------------------------

def _fused_kernel(pa_ref, wa_ref, masks_ref, ws2_ref, wb_ref, wse_ref,
                  o_ref, p5_ref, p3_ref, *, C, N, T3, T5, shifts):
    f32, bf16 = jnp.float32, jnp.bfloat16

    def leaky(v):
        return jnp.where(v >= 0, v, 0.01 * v)

    # One-time init of the K-padding rows of the patch scratch:
    #   row T*C  = all-ones bias row (bias folded as an extra weight column),
    #   rows >T*C = zeros (so padded weight columns contribute exactly 0).
    def init_pad(p_ref, rows_used):
        pad = (lax.broadcasted_iota(
            jnp.int32, (p_ref.shape[0] - rows_used, N), 0) == 0)
        p_ref[rows_used:, :] = pad.astype(f32)

    init_pad(p5_ref, T5 * C)
    init_pad(p3_ref, T3 * C)

    def build_patches(x, p_ref, T):
        # Row block t = x rolled by tap t (XLU lane rotate, static shift),
        # with wrapped / out-of-image lanes zeroed by the precomputed mask.
        for t in range(T):
            sh = shifts[t]
            rolled = pltpu.roll(x, shift=sh, axis=1) if sh else x
            p_ref[t * C:(t + 1) * C, :] = rolled * masks_ref[t]

    # --- stage A: main(5x5,s2) + scale0(3x3,s2) + skip(1x1,s2), one bf16 MXU
    #     pass over the wrapper-built im2col patch matrix (bias folded).
    a = jnp.dot(wa_ref[...], pa_ref[...], preferred_element_type=f32)  # (3C,N)
    main = a[0:C]
    s0 = leaky(a[C:2 * C])
    skip = a[2 * C:3 * C]

    # --- scale = sigmoid(conv3x3(s0))
    build_patches(s0, p3_ref, T3)
    scale = jax.nn.sigmoid(jnp.dot(ws2_ref[...], p3_ref[...].astype(bf16),
                                   preferred_element_type=f32))
    x1 = main * scale + skip                                           # f32 FMA

    # --- EASN: 5x5 main conv + 3x3 first scale conv share one patch matrix
    build_patches(x1, p5_ref, T5)
    bm = jnp.dot(wb_ref[...], p5_ref[...].astype(bf16),
                 preferred_element_type=f32)                           # (2C,N)
    em = bm[0:C]
    es = leaky(bm[C:2 * C])

    # --- escale = sigmoid(conv3x3(es))
    build_patches(es, p3_ref, T3)
    escale = jax.nn.sigmoid(jnp.dot(wse_ref[...], p3_ref[...].astype(bf16),
                                    preferred_element_type=f32))

    o_ref[...] = (em * escale + x1).astype(o_ref.dtype)                # f32 FMA


# ------------------------------ forward pass ---------------------------------

def easn_deep_enc_forward(params, x_nhwc):
    B, H, W, Cin = x_nhwc.shape
    Cout = params["main"][0].shape[-1]
    Ho = (H + 4 - 5) // 2 + 1
    Wo = (W + 4 - 5) // 2 + 1
    N = B * Ho * Wo
    T3, T5 = len(TAPS3), len(TAPS5)

    def rup(k, m=128):
        return ((k + m - 1) // m) * m

    KA = rup(T5 * Cin + 1)      # stage-A contraction: taps*Cin + bias row
    K5 = rup(T5 * Cout + 1)     # easn 5x5+3x3 contraction
    K3 = rup(T3 * Cout + 1)     # 3x3 scale-conv contractions

    # --- wrapper-side layout plumbing (free in XLA) ---
    # stride-2 im2col patches + ones bias row, zero-padded to a lane-multiple K
    pa = _im2col_stride2(x_nhwc, Ho, Wo, TAPS5)                      # (T5*Cin,N)
    pa = jnp.concatenate(
        [pa, jnp.ones((1, N), jnp.float32),
         jnp.zeros((KA - T5 * Cin - 1, N), jnp.float32)], axis=0
    ).astype(jnp.bfloat16)

    wa = _stack_w_bias([(params["main"], 2), (params["scale0"], 1),
                        (params["skip"], 0)], TAPS5, KA)             # (3C, KA)
    wb = _stack_w_bias([(params["easn_main"], 2),
                        (params["easn_scale0"], 1)], TAPS5, K5)      # (2C, K5)
    ws2 = _stack_w_bias([(params["scale2"], 1)], TAPS3, K3)          # (C, K3)
    wse = _stack_w_bias([(params["easn_scale2"], 1)], TAPS3, K3)     # (C, K3)

    masks = _tap_masks(Ho, Wo, Cout, N, TAPS5)                       # (T5, C, N)
    # pltpu.roll == jnp.roll:  out[:, n] = x[:, n + dy*Wo + dx]  needs this shift
    shifts = tuple((-(dy * Wo + dx)) % N for (dy, dx) in TAPS5)

    kernel = functools.partial(_fused_kernel, C=Cout, N=N,
                               T3=T3, T5=T5, shifts=shifts)

    def full(shape):
        return pl.BlockSpec(shape, lambda i, _s=shape: (0,) * len(_s))

    out_mat = pl.pallas_call(
        kernel,
        out_shape=jax.ShapeDtypeStruct((Cout, N), jnp.float32),
        grid=(1,),
        in_specs=[full(pa.shape), full(wa.shape), full(masks.shape),
                  full(ws2.shape), full(wb.shape), full(wse.shape)],
        out_specs=full((Cout, N)),
        scratch_shapes=[pltpu.VMEM((K5, N), jnp.float32),
                        pltpu.VMEM((K3, N), jnp.float32)],
        compiler_params=pltpu.CompilerParams(
            dimension_semantics=("arbitrary",)),
        # NOTE: at real resolutions, tile N on a "parallel" grid axis
        # (N_tile ~512 on v7x / ~1024 on v5e/v6e) and gather the stride-2
        # window in-kernel instead of wrapper-side im2col.
    )(pa, wa, masks, ws2, wb, wse)

    # (Cout, B*Ho*Wo) -> NHWC (wrapper-side layout plumbing)
    return out_mat.T.reshape(B, Ho, Wo, Cout)


# ------------------------------ parameters ----------------------------------

def _init_conv(key, cin, cout, k):
    bound = 1.0 / sqrt(cin * k * k)
    kw_, kb_ = jax.random.split(key)
    w = jax.random.uniform(kw_, (k, k, cin, cout), jnp.float32, -bound, bound)
    b = jax.random.uniform(kb_, (cout,), jnp.float32, -bound, bound)
    return w, b


def init_params(key, in_ch, out_ch):
    keys = jax.random.split(key, 7)
    return {
        "main":        _init_conv(keys[0], in_ch,  out_ch, 5),  # 5x5 s2 p2
        "scale0":      _init_conv(keys[1], in_ch,  out_ch, 3),  # 3x3 s2 p1
        "scale2":      _init_conv(keys[2], out_ch, out_ch, 3),  # 3x3 s1 p1
        "skip":        _init_conv(keys[3], in_ch,  out_ch, 1),  # 1x1 s2 p0
        "easn_main":   _init_conv(keys[4], out_ch, out_ch, 5),  # 5x5 s1 p2
        "easn_scale0": _init_conv(keys[5], out_ch, out_ch, 3),  # 3x3 s1 p1
        "easn_scale2": _init_conv(keys[6], out_ch, out_ch, 3),  # 3x3 s1 p1
    }


# ------------------------------ pure-JAX reference ---------------------------

def _conv_ref(x, w, b, stride, padding, act="none"):
    out = lax.conv_general_dilated(
        x, w, (stride, stride), [(padding, padding), (padding, padding)],
        dimension_numbers=("NHWC", "HWIO", "NHWC"))
    out = out + b
    if act == "leaky_relu":
        out = jnp.where(out >= 0, out, 0.01 * out)
    elif act == "sigmoid":
        out = jax.nn.sigmoid(out)
    return out


def ref_forward(params, x_nhwc):
    s = _conv_ref(x_nhwc, *params["scale0"], 2, 1, "leaky_relu")
    scale = _conv_ref(s, *params["scale2"], 1, 1, "sigmoid")
    main = _conv_ref(x_nhwc, *params["main"], 2, 2)
    skip = _conv_ref(x_nhwc, *params["skip"], 2, 0)
    x1 = main * scale + skip
    em = _conv_ref(x1, *params["easn_main"], 1, 2)
    es = _conv_ref(x1, *params["easn_scale0"], 1, 1, "leaky_relu")
    escale = _conv_ref(es, *params["easn_scale2"], 1, 1, "sigmoid")
    return em * escale + x1


# ---------------------------------- main -------------------------------------

if __name__ == "__main__":
    key = jax.random.PRNGKey(0)
    kx, kp = jax.random.split(key)
    B, in_ch, out_ch, H, W = 2, 4, 8, 16, 16

    x_nchw = jax.random.normal(kx, (B, in_ch, H, W), jnp.float32)  # PyTorch NCHW
    x_nhwc = jnp.transpose(x_nchw, (0, 2, 3, 1))                   # kernel layout
    params = init_params(kp, in_ch, out_ch)

    fwd = jax.jit(easn_deep_enc_forward)
    out = jax.block_until_ready(fwd(params, x_nhwc))

    ref = ref_forward(params, x_nhwc)
    assert out.shape == (B, H // 2, W // 2, out_ch), out.shape
    max_err = float(jnp.max(jnp.abs(out - ref)))
    # tolerance covers bf16 MXU operands (f32 accumulation) + MXU
    # accumulation-order differences vs the f32 lax.conv reference
    assert jnp.allclose(out, ref, atol=5e-2, rtol=5e-2), max_err

    print("KERNEL_OK")
</pallas_src>

<mosaic_0001>
module attributes {stable_mosaic.version = 11 : i64} {
  func.func @_fused_kernel(%arg0: i32, %arg1: memref<128x128xbf16, #tpu.memory_space<vmem>>, %arg2: memref<24x128xbf16, #tpu.memory_space<vmem>>, %arg3: memref<25x8x128xf32, #tpu.memory_space<vmem>>, %arg4: memref<8x128xbf16, #tpu.memory_space<vmem>>, %arg5: memref<16x256xbf16, #tpu.memory_space<vmem>>, %arg6: memref<8x128xbf16, #tpu.memory_space<vmem>>, %arg7: memref<8x128xf32, #tpu.memory_space<vmem>>, %arg8: memref<256x128xf32, #tpu.memory_space<vmem>>, %arg9: memref<128x128xf32, #tpu.memory_space<vmem>>) attributes {dimension_semantics = [#tpu.dimension_semantics<arbitrary>], iteration_bounds = array<i64: 1>, scalar_prefetch = 0 : i64, scratch_operands = 2 : i64, tpu.core_type = #tpu.core_type<tc>, window_params = [{pipeline_mode = #tpu.pipeline_mode<synchronous>, transform_indices = @transform_0, window_bounds = array<i64: 128, 128>}, {pipeline_mode = #tpu.pipeline_mode<synchronous>, transform_indices = @transform_1, window_bounds = array<i64: 24, 128>}, {pipeline_mode = #tpu.pipeline_mode<synchronous>, transform_indices = @transform_2, window_bounds = array<i64: 25, 8, 128>}, {pipeline_mode = #tpu.pipeline_mode<synchronous>, transform_indices = @transform_3, window_bounds = array<i64: 8, 128>}, {pipeline_mode = #tpu.pipeline_mode<synchronous>, transform_indices = @transform_4, window_bounds = array<i64: 16, 256>}, {pipeline_mode = #tpu.pipeline_mode<synchronous>, transform_indices = @transform_5, window_bounds = array<i64: 8, 128>}, {pipeline_mode = #tpu.pipeline_mode<synchronous>, transform_indices = @transform_6, window_bounds = array<i64: 8, 128>}]} {
    %0 = tpu.iota {dimensions = array<i32: 0>} : vector<56x128xi32>
    %c0_i32 = arith.constant 0 : i32
    %1 = vector.broadcast %c0_i32 : i32 to vector<56x128xi32>
    %2 = arith.cmpi eq, %0, %1 : vector<56x128xi32>
    %3 = arith.extui %2 : vector<56x128xi1> to vector<56x128xi32>
    %4 = arith.sitofp %3 : vector<56x128xi32> to vector<56x128xf32>
    %c200 = arith.constant 200 : index
    %c0 = arith.constant 0 : index
    %5 = vector.load %arg8[%c200, %c0] : memref<256x128xf32, #tpu.memory_space<vmem>>, vector<56x128xf32>
    tpu.vector_store %arg8[%c200, %c0], %4 {strides = array<i32>} : memref<256x128xf32, #tpu.memory_space<vmem>>, vector<56x128xf32>,
    %6 = tpu.iota {dimensions = array<i32: 0>} : vector<56x128xi32>
    %c0_i32_0 = arith.constant 0 : i32
    %7 = vector.broadcast %c0_i32_0 : i32 to vector<56x128xi32>
    %8 = arith.cmpi eq, %6, %7 : vector<56x128xi32>
    %9 = arith.extui %8 : vector<56x128xi1> to vector<56x128xi32>
    %10 = arith.sitofp %9 : vector<56x128xi32> to vector<56x128xf32>
    %c72 = arith.constant 72 : index
    %c0_1 = arith.constant 0 : index
    %11 = vector.load %arg9[%c72, %c0_1] : memref<128x128xf32, #tpu.memory_space<vmem>>, vector<56x128xf32>
    tpu.vector_store %arg9[%c72, %c0_1], %10 {strides = array<i32>} : memref<128x128xf32, #tpu.memory_space<vmem>>, vector<56x128xf32>,
    %c0_2 = arith.constant 0 : index
    %c0_3 = arith.constant 0 : index
    %12 = vector.load %arg2[%c0_2, %c0_3] : memref<24x128xbf16, #tpu.memory_space<vmem>>, vector<24x128xbf16>
    %c0_4 = arith.constant 0 : index
    %c0_5 = arith.constant 0 : index
    %13 = vector.load %arg1[%c0_4, %c0_5] : memref<128x128xbf16, #tpu.memory_space<vmem>>, vector<128x128xbf16>
    %cst = arith.constant dense<0.000000e+00> : vector<24x128xf32>
    %14 = tpu.matmul %12, %13, %cst {dimension_numbers = #tpu.dot_dimension_numbers<[1], [0], [0], [1], [0, 0, 1, 1], [], []>} : vector<24x128xbf16>, vector<128x128xbf16>, vector<24x128xf32> -> vector<24x128xf32>
    %15 = vector.extract_strided_slice %14 {offsets = [0, 0], sizes = [8, 128], strides = [1, 1]} : vector<24x128xf32> to vector<8x128xf32>
    %16 = vector.extract_strided_slice %14 {offsets = [8, 0], sizes = [8, 128], strides = [1, 1]} : vector<24x128xf32> to vector<8x128xf32>
    %cst_6 = arith.constant 0.000000e+00 : f32
    %17 = vector.broadcast %cst_6 : f32 to vector<8x128xf32>
    %18 = arith.cmpf oge, %16, %17 : vector<8x128xf32>
    %cst_7 = arith.constant 0.00999999977 : f32
    %19 = vector.broadcast %cst_7 : f32 to vector<8x128xf32>
    %20 = arith.mulf %19, %16 : vector<8x128xf32>
    %21 = arith.select %18, %16, %20 : vector<8x128xi1>, vector<8x128xf32>
    %22 = vector.extract_strided_slice %14 {offsets = [16, 0], sizes = [8, 128], strides = [1, 1]} : vector<24x128xf32> to vector<8x128xf32>
    %c9_i32 = arith.constant 9 : i32
    %23 = tpu.dynamic_rotate %21 by %c9_i32 dim 1 : vector<8x128xf32>, i32 -> vector<8x128xf32>
    %c0_8 = arith.constant 0 : index
    %c0_9 = arith.constant 0 : index
    %c0_10 = arith.constant 0 : index
    %24 = vector.load %arg3[%c0_8, %c0_9, %c0_10] : memref<25x8x128xf32, #tpu.memory_space<vmem>>, vector<1x8x128xf32>
    %25 = vector.shape_cast %24 : vector<1x8x128xf32> to vector<8x128xf32>
    %26 = arith.mulf %23, %25 : vector<8x128xf32>
    %c0_11 = arith.constant 0 : index
    %c0_12 = arith.constant 0 : index
    %27 = vector.load %arg9[%c0_11, %c0_12] : memref<128x128xf32, #tpu.memory_space<vmem>>, vector<8x128xf32>
    tpu.vector_store %arg9[%c0_11, %c0_12], %26 {strides = array<i32>} : memref<128x128xf32, #tpu.memory_space<vmem>>, vector<8x128xf32>,
    %c8_i32 = arith.constant 8 : i32
    %28 = tpu.dynamic_rotate %21 by %c8_i32 dim 1 : vector<8x128xf32>, i32 -> vector<8x128xf32>
    %c1 = arith.constant 1 : index
    %c0_13 = arith.constant 0 : index
    %c0_14 = arith.constant 0 : index
    %29 = vector.load %arg3[%c1, %c0_13, %c0_14] : memref<25x8x128xf32, #tpu.memory_space<vmem>>, vector<1x8x128xf32>
    %30 = vector.shape_cast %29 : vector<1x8x128xf32> to vector<8x128xf32>
    %31 = arith.mulf %28, %30 : vector<8x128xf32>
    %c8 = arith.constant 8 : index
    %c0_15 = arith.constant 0 : index
    %32 = vector.load %arg9[%c8, %c0_15] : memref<128x128xf32, #tpu.memory_space<vmem>>, vector<8x128xf32>
    tpu.vector_store %arg9[%c8, %c0_15], %31 {strides = array<i32>} : memref<128x128xf32, #tpu.memory_space<vmem>>, vector<8x128xf32>,
    %c7_i32 = arith.constant 7 : i32
    %33 = tpu.dynamic_rotate %21 by %c7_i32 dim 1 : vector<8x128xf32>, i32 -> vector<8x128xf32>
    %c2 = arith.constant 2 : index
    %c0_16 = arith.constant 0 : index
    %c0_17 = arith.constant 0 : index
    %34 = vector.load %arg3[%c2, %c0_16, %c0_17] : memref<25x8x128xf32, #tpu.memory_space<vmem>>, vector<1x8x128xf32>
    %35 = vector.shape_cast %34 : vector<1x8x128xf32> to vector<8x128xf32>
    %36 = arith.mulf %33, %35 : vector<8x128xf32>
    %c16 = arith.constant 16 : index
    %c0_18 = arith.constant 0 : index
    %37 = vector.load %arg9[%c16, %c0_18] : memref<128x128xf32, #tpu.memory_space<vmem>>, vector<8x128xf32>
    tpu.vector_store %arg9[%c16, %c0_18], %36 {strides = array<i32>} : memref<128x128xf32, #tpu.memory_space<vmem>>, vector<8x128xf32>,
    %c1_i32 = arith.constant 1 : i32
    %38 = tpu.dynamic_rotate %21 by %c1_i32 dim 1 : vector<8x128xf32>, i32 -> vector<8x128xf32>
    %c3 = arith.constant 3 : index
    %c0_19 = arith.constant 0 : index
    %c0_20 = arith.constant 0 : index
    %39 = vector.load %arg3[%c3, %c0_19, %c0_20] : memref<25x8x128xf32, #tpu.memory_space<vmem>>, vector<1x8x128xf32>
    %40 = vector.shape_cast %39 : vector<1x8x128xf32> to vector<8x128xf32>
    %41 = arith.mulf %38, %40 : vector<8x128xf32>
    %c24 = arith.constant 24 : index
    %c0_21 = arith.constant 0 : index
    %42 = vector.load %arg9[%c24, %c0_21] : memref<128x128xf32, #tpu.memory_space<vmem>>, vector<8x128xf32>
    tpu.vector_store %arg9[%c24, %c0_21], %41 {strides = array<i32>} : memref<128x128xf32, #tpu.memory_space<vmem>>, vector<8x128xf32>,
    %c4 = arith.constant 4 : index
    %c0_22 = arith.constant 0 : index
    %c0_23 = arith.constant 0 : index
    %43 = vector.load %arg3[%c4, %c0_22, %c0_23] : memref<25x8x128xf32, #tpu.memory_space<vmem>>, vector<1x8x128xf32>
    %44 = vector.shape_cast %43 : vector<1x8x128xf32> to vector<8x128xf32>
    %45 = arith.mulf %21, %44 : vector<8x128xf32>
    %c32 = arith.constant 32 : index
    %c0_24 = arith.constant 0 : index
    %46 = vector.load %arg9[%c32, %c0_24] : memref<128x128xf32, #tpu.memory_space<vmem>>, vector<8x128xf32>
    tpu.vector_store %arg9[%c32, %c0_24], %45 {strides = array<i32>} : memref<128x128xf32, #tpu.memory_space<vmem>>, vector<8x128xf32>,
    %c127_i32 = arith.constant 127 : i32
    %47 = tpu.dynamic_rotate %21 by %c127_i32 dim 1 : vector<8x128xf32>, i32 -> vector<8x128xf32>
    %c5 = arith.constant 5 : index
    %c0_25 = arith.constant 0 : index
    %c0_26 = arith.constant 0 : index
    %48 = vector.load %arg3[%c5, %c0_25, %c0_26] : memref<25x8x128xf32, #tpu.memory_space<vmem>>, vector<1x8x128xf32>
    %49 = vector.shape_cast %48 : vector<1x8x128xf32> to vector<8x128xf32>
    %50 = arith.mulf %47, %49 : vector<8x128xf32>
    %c40 = arith.constant 40 : index
    %c0_27 = arith.constant 0 : index
    %51 = vector.load %arg9[%c40, %c0_27] : memref<128x128xf32, #tpu.memory_space<vmem>>, vector<8x128xf32>
    tpu.vector_store %arg9[%c40, %c0_27], %50 {strides = array<i32>} : memref<128x128xf32, #tpu.memory_space<vmem>>, vector<8x128xf32>,
    %c121_i32 = arith.constant 121 : i32
    %52 = tpu.dynamic_rotate %21 by %c121_i32 dim 1 : vector<8x128xf32>, i32 -> vector<8x128xf32>
    %c6 = arith.constant 6 : index
    %c0_28 = arith.constant 0 : index
    %c0_29 = arith.constant 0 : index
    %53 = vector.load %arg3[%c6, %c0_28, %c0_29] : memref<25x8x128xf32, #tpu.memory_space<vmem>>, vector<1x8x128xf32>
    %54 = vector.shape_cast %53 : vector<1x8x128xf32> to vector<8x128xf32>
    %55 = arith.mulf %52, %54 : vector<8x128xf32>
    %c48 = arith.constant 48 : index
    %c0_30 = arith.constant 0 : index
    %56 = vector.load %arg9[%c48, %c0_30] : memref<128x128xf32, #tpu.memory_space<vmem>>, vector<8x128xf32>
    tpu.vector_store %arg9[%c48, %c0_30], %55 {strides = array<i32>} : memref<128x128xf32, #tpu.memory_space<vmem>>, vector<8x128xf32>,
    %c120_i32 = arith.constant 120 : i32
    %57 = tpu.dynamic_rotate %21 by %c120_i32 dim 1 : vector<8x128xf32>, i32 -> vector<8x128xf32>
    %c7 = arith.constant 7 : index
    %c0_31 = arith.constant 0 : index
    %c0_32 = arith.constant 0 : index
    %58 = vector.load %arg3[%c7, %c0_31, %c0_32] : memref<25x8x128xf32, #tpu.memory_space<vmem>>, vector<1x8x128xf32>
    %59 = vector.shape_cast %58 : vector<1x8x128xf32> to vector<8x128xf32>
    %60 = arith.mulf %57, %59 : vector<8x128xf32>
    %c56 = arith.constant 56 : index
    %c0_33 = arith.constant 0 : index
    %61 = vector.load %arg9[%c56, %c0_33] : memref<128x128xf32, #tpu.memory_space<vmem>>, vector<8x128xf32>
    tpu.vector_store %arg9[%c56, %c0_33], %60 {strides = array<i32>} : memref<128x128xf32, #tpu.memory_space<vmem>>, vector<8x128xf32>,
    %c119_i32 = arith.constant 119 : i32
    %62 = tpu.dynamic_rotate %21 by %c119_i32 dim 1 : vector<8x128xf32>, i32 -> vector<8x128xf32>
    %c8_34 = arith.constant 8 : index
    %c0_35 = arith.constant 0 : index
    %c0_36 = arith.constant 0 : index
    %63 = vector.load %arg3[%c8_34, %c0_35, %c0_36] : memref<25x8x128xf32, #tpu.memory_space<vmem>>, vector<1x8x128xf32>
    %64 = vector.shape_cast %63 : vector<1x8x128xf32> to vector<8x128xf32>
    %65 = arith.mulf %62, %64 : vector<8x128xf32>
    %c64 = arith.constant 64 : index
    %c0_37 = arith.constant 0 : index
    %66 = vector.load %arg9[%c64, %c0_37] : memref<128x128xf32, #tpu.memory_space<vmem>>, vector<8x128xf32>
    tpu.vector_store %arg9[%c64, %c0_37], %65 {strides = array<i32>} : memref<128x128xf32, #tpu.memory_space<vmem>>, vector<8x128xf32>,
    %c0_38 = arith.constant 0 : index
    %c0_39 = arith.constant 0 : index
    %67 = vector.load %arg4[%c0_38, %c0_39] : memref<8x128xbf16, #tpu.memory_space<vmem>>, vector<8x128xbf16>
    %c0_40 = arith.constant 0 : index
    %c0_41 = arith.constant 0 : index
    %68 = vector.load %arg9[%c0_40, %c0_41] : memref<128x128xf32, #tpu.memory_space<vmem>>, vector<128x128xf32>
    %69 = arith.truncf %68 : vector<128x128xf32> to vector<128x128xbf16>
    %cst_42 = arith.constant dense<0.000000e+00> : vector<8x128xf32>
    %70 = tpu.matmul %67, %69, %cst_42 {dimension_numbers = #tpu.dot_dimension_numbers<[1], [0], [0], [1], [0, 0, 1, 1], [], []>} : vector<8x128xbf16>, vector<128x128xbf16>, vector<8x128xf32> -> vector<8x128xf32>
    %71 = arith.negf %70 : vector<8x128xf32>
    %72 = math.exp %71 : vector<8x128xf32>
    %cst_43 = arith.constant 1.000000e+00 : f32
    %73 = vector.broadcast %cst_43 : f32 to vector<8x128xf32>
    %74 = arith.addf %73, %72 : vector<8x128xf32>
    %75 = arith.divf %73, %74 : vector<8x128xf32>
    %76 = arith.mulf %15, %75 : vector<8x128xf32>
    %77 = arith.addf %76, %22 : vector<8x128xf32>
    %c9_i32_44 = arith.constant 9 : i32
    %78 = tpu.dynamic_rotate %77 by %c9_i32_44 dim 1 : vector<8x128xf32>, i32 -> vector<8x128xf32>
    %c0_45 = arith.constant 0 : index
    %c0_46 = arith.constant 0 : index
    %c0_47 = arith.constant 0 : index
    %79 = vector.load %arg3[%c0_45, %c0_46, %c0_47] : memref<25x8x128xf32, #tpu.memory_space<vmem>>, vector<1x8x128xf32>
    %80 = vector.shape_cast %79 : vector<1x8x128xf32> to vector<8x128xf32>
    %81 = arith.mulf %78, %80 : vector<8x128xf32>
    %c0_48 = arith.constant 0 : index
    %c0_49 = arith.constant 0 : index
    %82 = vector.load %arg8[%c0_48, %c0_49] : memref<256x128xf32, #tpu.memory_space<vmem>>, vector<8x128xf32>
    tpu.vector_store %arg8[%c0_48, %c0_49], %81 {strides = array<i32>} : memref<256x128xf32, #tpu.memory_space<vmem>>, vector<8x128xf32>,
    %c8_i32_50 = arith.constant 8 : i32
    %83 = tpu.dynamic_rotate %77 by %c8_i32_50 dim 1 : vector<8x128xf32>, i32 -> vector<8x128xf32>
    %c1_51 = arith.constant 1 : index
    %c0_52 = arith.constant 0 : index
    %c0_53 = arith.constant 0 : index
    %84 = vector.load %arg3[%c1_51, %c0_52, %c0_53] : memref<25x8x128xf32, #tpu.memory_space<vmem>>, vector<1x8x128xf32>
    %85 = vector.shape_cast %84 : vector<1x8x128xf32> to vector<8x128xf32>
    %86 = arith.mulf %83, %85 : vector<8x128xf32>
    %c8_54 = arith.constant 8 : index
    %c0_55 = arith.constant 0 : index
    %87 = vector.load %arg8[%c8_54, %c0_55] : memref<256x128xf32, #tpu.memory_space<vmem>>, vector<8x128xf32>
    tpu.vector_store %arg8[%c8_54, %c0_55], %86 {strides = array<i32>} : memref<256x128xf32, #tpu.memory_space<vmem>>, vector<8x128xf32>,
    %c7_i32_56 = arith.constant 7 : i32
    %88 = tpu.dynamic_rotate %77 by %c7_i32_56 dim 1 : vector<8x128xf32>, i32 -> vector<8x128xf32>
    %c2_57 = arith.constant 2 : index
    %c0_58 = arith.constant 0 : index
    %c0_59 = arith.constant 0 : index
    %89 = vector.load %arg3[%c2_57, %c0_58, %c0_59] : memref<25x8x128xf32, #tpu.memory_space<vmem>>, vector<1x8x128xf32>
    %90 = vector.shape_cast %89 : vector<1x8x128xf32> to vector<8x128xf32>
    %91 = arith.mulf %88, %90 : vector<8x128xf32>
    %c16_60 = arith.constant 16 : index
    %c0_61 = arith.constant 0 : index
    %92 = vector.load %arg8[%c16_60, %c0_61] : memref<256x128xf32, #tpu.memory_space<vmem>>, vector<8x128xf32>
    tpu.vector_store %arg8[%c16_60, %c0_61], %91 {strides = array<i32>} : memref<256x128xf32, #tpu.memory_space<vmem>>, vector<8x128xf32>,
    %c1_i32_62 = arith.constant 1 : i32
    %93 = tpu.dynamic_rotate %77 by %c1_i32_62 dim 1 : vector<8x128xf32>, i32 -> vector<8x128xf32>
    %c3_63 = arith.constant 3 : index
    %c0_64 = arith.constant 0 : index
    %c0_65 = arith.constant 0 : index
    %94 = vector.load %arg3[%c3_63, %c0_64, %c0_65] : memref<25x8x128xf32, #tpu.memory_space<vmem>>, vector<1x8x128xf32>
    %95 = vector.shape_cast %94 : vector<1x8x128xf32> to vector<8x128xf32>
    %96 = arith.mulf %93, %95 : vector<8x128xf32>
    %c24_66 = arith.constant 24 : index
    %c0_67 = arith.constant 0 : index
    %97 = vector.load %arg8[%c24_66, %c0_67] : memref<256x128xf32, #tpu.memory_space<vmem>>, vector<8x128xf32>
    tpu.vector_store %arg8[%c24_66, %c0_67], %96 {strides = array<i32>} : memref<256x128xf32, #tpu.memory_space<vmem>>, vector<8x128xf32>,
    %c4_68 = arith.constant 4 : index
    %c0_69 = arith.constant 0 : index
    %c0_70 = arith.constant 0 : index
    %98 = vector.load %arg3[%c4_68, %c0_69, %c0_70] : memref<25x8x128xf32, #tpu.memory_space<vmem>>, vector<1x8x128xf32>
    %99 = vector.shape_cast %98 : vector<1x8x128xf32> to vector<8x128xf32>
    %100 = arith.mulf %77, %99 : vector<8x128xf32>
    %c32_71 = arith.constant 32 : index
    %c0_72 = arith.constant 0 : index
    %101 = vector.load %arg8[%c32_71, %c0_72] : memref<256x128xf32, #tpu.memory_space<vmem>>, vector<8x128xf32>
    tpu.vector_store %arg8[%c32_71, %c0_72], %100 {strides = array<i32>} : memref<256x128xf32, #tpu.memory_space<vmem>>, vector<8x128xf32>,
    %c127_i32_73 = arith.constant 127 : i32
    %102 = tpu.dynamic_rotate %77 by %c127_i32_73 dim 1 : vector<8x128xf32>, i32 -> vector<8x128xf32>
    %c5_74 = arith.constant 5 : index
    %c0_75 = arith.constant 0 : index
    %c0_76 = arith.constant 0 : index
    %103 = vector.load %arg3[%c5_74, %c0_75, %c0_76] : memref<25x8x128xf32, #tpu.memory_space<vmem>>, vector<1x8x128xf32>
    %104 = vector.shape_cast %103 : vector<1x8x128xf32> to vector<8x128xf32>
    %105 = arith.mulf %102, %104 : vector<8x128xf32>
    %c40_77 = arith.constant 40 : index
    %c0_78 = arith.constant 0 : index
    %106 = vector.load %arg8[%c40_77, %c0_78] : memref<256x128xf32, #tpu.memory_space<vmem>>, vector<8x128xf32>
    tpu.vector_store %arg8[%c40_77, %c0_78], %105 {strides = array<i32>} : memref<256x128xf32, #tpu.memory_space<vmem>>, vector<8x128xf32>,
    %c121_i32_79 = arith.constant 121 : i32
    %107 = tpu.dynamic_rotate %77 by %c121_i32_79 dim 1 : vector<8x128xf32>, i32 -> vector<8x128xf32>
    %c6_80 = arith.constant 6 : index
    %c0_81 = arith.constant 0 : index
    %c0_82 = arith.constant 0 : index
    %108 = vector.load %arg3[%c6_80, %c0_81, %c0_82] : memref<25x8x128xf32, #tpu.memory_space<vmem>>, vector<1x8x128xf32>
    %109 = vector.shape_cast %108 : vector<1x8x128xf32> to vector<8x128xf32>
    %110 = arith.mulf %107, %109 : vector<8x128xf32>
    %c48_83 = arith.constant 48 : index
    %c0_84 = arith.constant 0 : index
    %111 = vector.load %arg8[%c48_83, %c0_84] : memref<256x128xf32, #tpu.memory_space<vmem>>, vector<8x128xf32>
    tpu.vector_store %arg8[%c48_83, %c0_84], %110 {strides = array<i32>} : memref<256x128xf32, #tpu.memory_space<vmem>>, vector<8x128xf32>,
    %c120_i32_85 = arith.constant 120 : i32
    %112 = tpu.dynamic_rotate %77 by %c120_i32_85 dim 1 : vector<8x128xf32>, i32 -> vector<8x128xf32>
    %c7_86 = arith.constant 7 : index
    %c0_87 = arith.constant 0 : index
    %c0_88 = arith.constant 0 : index
    %113 = vector.load %arg3[%c7_86, %c0_87, %c0_88] : memref<25x8x128xf32, #tpu.memory_space<vmem>>, vector<1x8x128xf32>
    %114 = vector.shape_cast %113 : vector<1x8x128xf32> to vector<8x128xf32>
    %115 = arith.mulf %112, %114 : vector<8x128xf32>
    %c56_89 = arith.constant 56 : index
    %c0_90 = arith.constant 0 : index
    %116 = vector.load %arg8[%c56_89, %c0_90] : memref<256x128xf32, #tpu.memory_space<vmem>>, vector<8x128xf32>
    tpu.vector_store %arg8[%c56_89, %c0_90], %115 {strides = array<i32>} : memref<256x128xf32, #tpu.memory_space<vmem>>, vector<8x128xf32>,
    %c119_i32_91 = arith.constant 119 : i32
    %117 = tpu.dynamic_rotate %77 by %c119_i32_91 dim 1 : vector<8x128xf32>, i32 -> vector<8x128xf32>
    %c8_92 = arith.constant 8 : index
    %c0_93 = arith.constant 0 : index
    %c0_94 = arith.constant 0 : index
    %118 = vector.load %arg3[%c8_92, %c0_93, %c0_94] : memref<25x8x128xf32, #tpu.memory_space<vmem>>, vector<1x8x128xf32>
    %119 = vector.shape_cast %118 : vector<1x8x128xf32> to vector<8x128xf32>
    %120 = arith.mulf %117, %119 : vector<8x128xf32>
    %c64_95 = arith.constant 64 : index
    %c0_96 = arith.constant 0 : index
    %121 = vector.load %arg8[%c64_95, %c0_96] : memref<256x128xf32, #tpu.memory_space<vmem>>, vector<8x128xf32>
    tpu.vector_store %arg8[%c64_95, %c0_96], %120 {strides = array<i32>} : memref<256x128xf32, #tpu.memory_space<vmem>>, vector<8x128xf32>,
    %c18_i32 = arith.constant 18 : i32
    %122 = tpu.dynamic_rotate %77 by %c18_i32 dim 1 : vector<8x128xf32>, i32 -> vector<8x128xf32>
    %c9 = arith.constant 9 : index
    %c0_97 = arith.constant 0 : index
    %c0_98 = arith.constant 0 : index
    %123 = vector.load %arg3[%c9, %c0_97, %c0_98] : memref<25x8x128xf32, #tpu.memory_space<vmem>>, vector<1x8x128xf32>
    %124 = vector.shape_cast %123 : vector<1x8x128xf32> to vector<8x128xf32>
    %125 = arith.mulf %122, %124 : vector<8x128xf32>
    %c72_99 = arith.constant 72 : index
    %c0_100 = arith.constant 0 : index
    %126 = vector.load %arg8[%c72_99, %c0_100] : memref<256x128xf32, #tpu.memory_space<vmem>>, vector<8x128xf32>
    tpu.vector_store %arg8[%c72_99, %c0_100], %125 {strides = array<i32>} : memref<256x128xf32, #tpu.memory_space<vmem>>, vector<8x128xf32>,
    %c17_i32 = arith.constant 17 : i32
    %127 = tpu.dynamic_rotate %77 by %c17_i32 dim 1 : vector<8x128xf32>, i32 -> vector<8x128xf32>
    %c10 = arith.constant 10 : index
    %c0_101 = arith.constant 0 : index
    %c0_102 = arith.constant 0 : index
    %128 = vector.load %arg3[%c10, %c0_101, %c0_102] : memref<25x8x128xf32, #tpu.memory_space<vmem>>, vector<1x8x128xf32>
    %129 = vector.shape_cast %128 : vector<1x8x128xf32> to vector<8x128xf32>
    %130 = arith.mulf %127, %129 : vector<8x128xf32>
    %c80 = arith.constant 80 : index
    %c0_103 = arith.constant 0 : index
    %131 = vector.load %arg8[%c80, %c0_103] : memref<256x128xf32, #tpu.memory_space<vmem>>, vector<8x128xf32>
    tpu.vector_store %arg8[%c80, %c0_103], %130 {strides = array<i32>} : memref<256x128xf32, #tpu.memory_space<vmem>>, vector<8x128xf32>,
    %c16_i32 = arith.constant 16 : i32
    %132 = tpu.dynamic_rotate %77 by %c16_i32 dim 1 : vector<8x128xf32>, i32 -> vector<8x128xf32>
    %c11 = arith.constant 11 : index
    %c0_104 = arith.constant 0 : index
    %c0_105 = arith.constant 0 : index
    %133 = vector.load %arg3[%c11, %c0_104, %c0_105] : memref<25x8x128xf32, #tpu.memory_space<vmem>>, vector<1x8x128xf32>
    %134 = vector.shape_cast %133 : vector<1x8x128xf32> to vector<8x128xf32>
    %135 = arith.mulf %132, %134 : vector<8x128xf32>
    %c88 = arith.constant 88 : index
    %c0_106 = arith.constant 0 : index
    %136 = vector.load %arg8[%c88, %c0_106] : memref<256x128xf32, #tpu.memory_space<vmem>>, vector<8x128xf32>
    tpu.vector_store %arg8[%c88, %c0_106], %135 {strides = array<i32>} : memref<256x128xf32, #tpu.memory_space<vmem>>, vector<8x128xf32>,
    %c15_i32 = arith.constant 15 : i32
    %137 = tpu.dynamic_rotate %77 by %c15_i32 dim 1 : vector<8x128xf32>, i32 -> vector<8x128xf32>
    %c12 = arith.constant 12 : index
    %c0_107 = arith.constant 0 : index
    %c0_108 = arith.constant 0 : index
    %138 = vector.load %arg3[%c12, %c0_107, %c0_108] : memref<25x8x128xf32, #tpu.memory_space<vmem>>, vector<1x8x128xf32>
    %139 = vector.shape_cast %138 : vector<1x8x128xf32> to vector<8x128xf32>
    %140 = arith.mulf %137, %139 : vector<8x128xf32>
    %c96 = arith.constant 96 : index
    %c0_109 = arith.constant 0 : index
    %141 = vector.load %arg8[%c96, %c0_109] : memref<256x128xf32, #tpu.memory_space<vmem>>, vector<8x128xf32>
    tpu.vector_store %arg8[%c96, %c0_109], %140 {strides = array<i32>} : memref<256x128xf32, #tpu.memory_space<vmem>>, vector<8x128xf32>,
    %c14_i32 = arith.constant 14 : i32
    %142 = tpu.dynamic_rotate %77 by %c14_i32 dim 1 : vector<8x128xf32>, i32 -> vector<8x128xf32>
    %c13 = arith.constant 13 : index
    %c0_110 = arith.constant 0 : index
    %c0_111 = arith.constant 0 : index
    %143 = vector.load %arg3[%c13, %c0_110, %c0_111] : memref<25x8x128xf32, #tpu.memory_space<vmem>>, vector<1x8x128xf32>
    %144 = vector.shape_cast %143 : vector<1x8x128xf32> to vector<8x128xf32>
    %145 = arith.mulf %142, %144 : vector<8x128xf32>
    %c104 = arith.constant 104 : index
    %c0_112 = arith.constant 0 : index
    %146 = vector.load %arg8[%c104, %c0_112] : memref<256x128xf32, #tpu.memory_space<vmem>>, vector<8x128xf32>
    tpu.vector_store %arg8[%c104, %c0_112], %145 {strides = array<i32>} : memref<256x128xf32, #tpu.memory_space<vmem>>, vector<8x128xf32>,
    %c10_i32 = arith.constant 10 : i32
    %147 = tpu.dynamic_rotate %77 by %c10_i32 dim 1 : vector<8x128xf32>, i32 -> vector<8x128xf32>
    %c14 = arith.constant 14 : index
    %c0_113 = arith.constant 0 : index
    %c0_114 = arith.constant 0 : index
    %148 = vector.load %arg3[%c14, %c0_113, %c0_114] : memref<25x8x128xf32, #tpu.memory_space<vmem>>, vector<1x8x128xf32>
    %149 = vector.shape_cast %148 : vector<1x8x128xf32> to vector<8x128xf32>
    %150 = arith.mulf %147, %149 : vector<8x128xf32>
    %c112 = arith.constant 112 : index
    %c0_115 = arith.constant 0 : index
    %151 = vector.load %arg8[%c112, %c0_115] : memref<256x128xf32, #tpu.memory_space<vmem>>, vector<8x128xf32>
    tpu.vector_store %arg8[%c112, %c0_115], %150 {strides = array<i32>} : memref<256x128xf32, #tpu.memory_space<vmem>>, vector<8x128xf32>,
    %c6_i32 = arith.constant 6 : i32
    %152 = tpu.dynamic_rotate %77 by %c6_i32 dim 1 : vector<8x128xf32>, i32 -> vector<8x128xf32>
    %c15 = arith.constant 15 : index
    %c0_116 = arith.constant 0 : index
    %c0_117 = arith.constant 0 : index
    %153 = vector.load %arg3[%c15, %c0_116, %c0_117] : memref<25x8x128xf32, #tpu.memory_space<vmem>>, vector<1x8x128xf32>
    %154 = vector.shape_cast %153 : vector<1x8x128xf32> to vector<8x128xf32>
    %155 = arith.mulf %152, %154 : vector<8x128xf32>
    %c120 = arith.constant 120 : index
    %c0_118 = arith.constant 0 : index
    %156 = vector.load %arg8[%c120, %c0_118] : memref<256x128xf32, #tpu.memory_space<vmem>>, vector<8x128xf32>
    tpu.vector_store %arg8[%c120, %c0_118], %155 {strides = array<i32>} : memref<256x128xf32, #tpu.memory_space<vmem>>, vector<8x128xf32>,
    %c2_i32 = arith.constant 2 : i32
    %157 = tpu.dynamic_rotate %77 by %c2_i32 dim 1 : vector<8x128xf32>, i32 -> vector<8x128xf32>
    %c16_119 = arith.constant 16 : index
    %c0_120 = arith.constant 0 : index
    %c0_121 = arith.constant 0 : index
    %158 = vector.load %arg3[%c16_119, %c0_120, %c0_121] : memref<25x8x128xf32, #tpu.memory_space<vmem>>, vector<1x8x128xf32>
    %159 = vector.shape_cast %158 : vector<1x8x128xf32> to vector<8x128xf32>
    %160 = arith.mulf %157, %159 : vector<8x128xf32>
    %c128 = arith.constant 128 : index
    %c0_122 = arith.constant 0 : index
    %161 = vector.load %arg8[%c128, %c0_122] : memref<256x128xf32, #tpu.memory_space<vmem>>, vector<8x128xf32>
    tpu.vector_store %arg8[%c128, %c0_122], %160 {strides = array<i32>} : memref<256x128xf32, #tpu.memory_space<vmem>>, vector<8x128xf32>,
    %c126_i32 = arith.constant 126 : i32
    %162 = tpu.dynamic_rotate %77 by %c126_i32 dim 1 : vector<8x128xf32>, i32 -> vector<8x128xf32>
    %c17 = arith.constant 17 : index
    %c0_123 = arith.constant 0 : index
    %c0_124 = arith.constant 0 : index
    %163 = vector.load %arg3[%c17, %c0_123, %c0_124] : memref<25x8x128xf32, #tpu.memory_space<vmem>>, vector<1x8x128xf32>
    %164 = vector.shape_cast %163 : vector<1x8x128xf32> to vector<8x128xf32>
    %165 = arith.mulf %162, %164 : vector<8x128xf32>
    %c136 = arith.constant 136 : index
    %c0_125 = arith.constant 0 : index
    %166 = vector.load %arg8[%c136, %c0_125] : memref<256x128xf32, #tpu.memory_space<vmem>>, vector<8x128xf32>
    tpu.vector_store %arg8[%c136, %c0_125], %165 {strides = array<i32>} : memref<256x128xf32, #tpu.memory_space<vmem>>, vector<8x128xf32>,
    %c122_i32 = arith.constant 122 : i32
    %167 = tpu.dynamic_rotate %77 by %c122_i32 dim 1 : vector<8x128xf32>, i32 -> vector<8x128xf32>
    %c18 = arith.constant 18 : index
    %c0_126 = arith.constant 0 : index
    %c0_127 = arith.constant 0 : index
    %168 = vector.load %arg3[%c18, %c0_126, %c0_127] : memref<25x8x128xf32, #tpu.memory_space<vmem>>, vector<1x8x128xf32>
    %169 = vector.shape_cast %168 : vector<1x8x128xf32> to vector<8x128xf32>
    %170 = arith.mulf %167, %169 : vector<8x128xf32>
    %c144 = arith.constant 144 : index
    %c0_128 = arith.constant 0 : index
    %171 = vector.load %arg8[%c144, %c0_128] : memref<256x128xf32, #tpu.memory_space<vmem>>, vector<8x128xf32>
    tpu.vector_store %arg8[%c144, %c0_128], %170 {strides = array<i32>} : memref<256x128xf32, #tpu.memory_space<vmem>>, vector<8x128xf32>,
    %c118_i32 = arith.constant 118 : i32
    %172 = tpu.dynamic_rotate %77 by %c118_i32 dim 1 : vector<8x128xf32>, i32 -> vector<8x128xf32>
    %c19 = arith.constant 19 : index
    %c0_129 = arith.constant 0 : index
    %c0_130 = arith.constant 0 : index
    %173 = vector.load %arg3[%c19, %c0_129, %c0_130] : memref<25x8x128xf32, #tpu.memory_space<vmem>>, vector<1x8x128xf32>
    %174 = vector.shape_cast %173 : vector<1x8x128xf32> to vector<8x128xf32>
    %175 = arith.mulf %172, %174 : vector<8x128xf32>
    %c152 = arith.constant 152 : index
    %c0_131 = arith.constant 0 : index
    %176 = vector.load %arg8[%c152, %c0_131] : memref<256x128xf32, #tpu.memory_space<vmem>>, vector<8x128xf32>
    tpu.vector_store %arg8[%c152, %c0_131], %175 {strides = array<i32>} : memref<256x128xf32, #tpu.memory_space<vmem>>, vector<8x128xf32>,
    %c114_i32 = arith.constant 114 : i32
    %177 = tpu.dynamic_rotate %77 by %c114_i32 dim 1 : vector<8x128xf32>, i32 -> vector<8x128xf32>
    %c20 = arith.constant 20 : index
    %c0_132 = arith.constant 0 : index
    %c0_133 = arith.constant 0 : index
    %178 = vector.load %arg3[%c20, %c0_132, %c0_133] : memref<25x8x128xf32, #tpu.memory_space<vmem>>, vector<1x8x128xf32>
    %179 = vector.shape_cast %178 : vector<1x8x128xf32> to vector<8x128xf32>
    %180 = arith.mulf %177, %179 : vector<8x128xf32>
    %c160 = arith.constant 160 : index
    %c0_134 = arith.constant 0 : index
    %181 = vector.load %arg8[%c160, %c0_134] : memref<256x128xf32, #tpu.memory_space<vmem>>, vector<8x128xf32>
    tpu.vector_store %arg8[%c160, %c0_134], %180 {strides = array<i32>} : memref<256x128xf32, #tpu.memory_space<vmem>>, vector<8x128xf32>,
    %c113_i32 = arith.constant 113 : i32
    %182 = tpu.dynamic_rotate %77 by %c113_i32 dim 1 : vector<8x128xf32>, i32 -> vector<8x128xf32>
    %c21 = arith.constant 21 : index
    %c0_135 = arith.constant 0 : index
    %c0_136 = arith.constant 0 : index
    %183 = vector.load %arg3[%c21, %c0_135, %c0_136] : memref<25x8x128xf32, #tpu.memory_space<vmem>>, vector<1x8x128xf32>
    %184 = vector.shape_cast %183 : vector<1x8x128xf32> to vector<8x128xf32>
    %185 = arith.mulf %182, %184 : vector<8x128xf32>
    %c168 = arith.constant 168 : index
    %c0_137 = arith.constant 0 : index
    %186 = vector.load %arg8[%c168, %c0_137] : memref<256x128xf32, #tpu.memory_space<vmem>>, vector<8x128xf32>
    tpu.vector_store %arg8[%c168, %c0_137], %185 {strides = array<i32>} : memref<256x128xf32, #tpu.memory_space<vmem>>, vector<8x128xf32>,
    %c112_i32 = arith.constant 112 : i32
    %187 = tpu.dynamic_rotate %77 by %c112_i32 dim 1 : vector<8x128xf32>, i32 -> vector<8x128xf32>
    %c22 = arith.constant 22 : index
    %c0_138 = arith.constant 0 : index
    %c0_139 = arith.constant 0 : index
    %188 = vector.load %arg3[%c22, %c0_138, %c0_139] : memref<25x8x128xf32, #tpu.memory_space<vmem>>, vector<1x8x128xf32>
    %189 = vector.shape_cast %188 : vector<1x8x128xf32> to vector<8x128xf32>
    %190 = arith.mulf %187, %189 : vector<8x128xf32>
    %c176 = arith.constant 176 : index
    %c0_140 = arith.constant 0 : index
    %191 = vector.load %arg8[%c176, %c0_140] : memref<256x128xf32, #tpu.memory_space<vmem>>, vector<8x128xf32>
    tpu.vector_store %arg8[%c176, %c0_140], %190 {strides = array<i32>} : memref<256x128xf32, #tpu.memory_space<vmem>>, vector<8x128xf32>,
    %c111_i32 = arith.constant 111 : i32
    %192 = tpu.dynamic_rotate %77 by %c111_i32 dim 1 : vector<8x128xf32>, i32 -> vector<8x128xf32>
    %c23 = arith.constant 23 : index
    %c0_141 = arith.constant 0 : index
    %c0_142 = arith.constant 0 : index
    %193 = vector.load %arg3[%c23, %c0_141, %c0_142] : memref<25x8x128xf32, #tpu.memory_space<vmem>>, vector<1x8x128xf32>
    %194 = vector.shape_cast %193 : vector<1x8x128xf32> to vector<8x128xf32>
    %195 = arith.mulf %192, %194 : vector<8x128xf32>
    %c184 = arith.constant 184 : index
    %c0_143 = arith.constant 0 : index
    %196 = vector.load %arg8[%c184, %c0_143] : memref<256x128xf32, #tpu.memory_space<vmem>>, vector<8x128xf32>
    tpu.vector_store %arg8[%c184, %c0_143], %195 {strides = array<i32>} : memref<256x128xf32, #tpu.memory_space<vmem>>, vector<8x128xf32>,
    %c110_i32 = arith.constant 110 : i32
    %197 = tpu.dynamic_rotate %77 by %c110_i32 dim 1 : vector<8x128xf32>, i32 -> vector<8x128xf32>
    %c24_144 = arith.constant 24 : index
    %c0_145 = arith.constant 0 : index
    %c0_146 = arith.constant 0 : index
    %198 = vector.load %arg3[%c24_144, %c0_145, %c0_146] : memref<25x8x128xf32, #tpu.memory_space<vmem>>, vector<1x8x128xf32>
    %199 = vector.shape_cast %198 : vector<1x8x128xf32> to vector<8x128xf32>
    %200 = arith.mulf %197, %199 : vector<8x128xf32>
    %c192 = arith.constant 192 : index
    %c0_147 = arith.constant 0 : index
    %201 = vector.load %arg8[%c192, %c0_147] : memref<256x128xf32, #tpu.memory_space<vmem>>, vector<8x128xf32>
    tpu.vector_store %arg8[%c192, %c0_147], %200 {strides = array<i32>} : memref<256x128xf32, #tpu.memory_space<vmem>>, vector<8x128xf32>,
    %c0_148 = arith.constant 0 : index
    %c0_149 = arith.constant 0 : index
    %202 = vector.load %arg5[%c0_148, %c0_149] : memref<16x256xbf16, #tpu.memory_space<vmem>>, vector<16x256xbf16>
    %c0_150 = arith.constant 0 : index
    %c0_151 = arith.constant 0 : index
    %203 = vector.load %arg8[%c0_150, %c0_151] : memref<256x128xf32, #tpu.memory_space<vmem>>, vector<256x128xf32>
    %204 = arith.truncf %203 : vector<256x128xf32> to vector<256x128xbf16>
    %cst_152 = arith.constant dense<0.000000e+00> : vector<16x128xf32>
    %205 = tpu.matmul %202, %204, %cst_152 {dimension_numbers = #tpu.dot_dimension_numbers<[1], [0], [0], [1], [0, 0, 1, 1], [], []>} : vector<16x256xbf16>, vector<256x128xbf16>, vector<16x128xf32> -> vector<16x128xf32>
    %206 = vector.extract_strided_slice %205 {offsets = [0, 0], sizes = [8, 128], strides = [1, 1]} : vector<16x128xf32> to vector<8x128xf32>
    %207 = vector.extract_strided_slice %205 {offsets = [8, 0], sizes = [8, 128], strides = [1, 1]} : vector<16x128xf32> to vector<8x128xf32>
    %cst_153 = arith.constant 0.000000e+00 : f32
    %208 = vector.broadcast %cst_153 : f32 to vector<8x128xf32>
    %209 = arith.cmpf oge, %207, %208 : vector<8x128xf32>
    %cst_154 = arith.constant 0.00999999977 : f32
    %210 = vector.broadcast %cst_154 : f32 to vector<8x128xf32>
    %211 = arith.mulf %210, %207 : vector<8x128xf32>
    %212 = arith.select %209, %207, %211 : vector<8x128xi1>, vector<8x128xf32>
    %c9_i32_155 = arith.constant 9 : i32
    %213 = tpu.dynamic_rotate %212 by %c9_i32_155 dim 1 : vector<8x128xf32>, i32 -> vector<8x128xf32>
    %c0_156 = arith.constant 0 : index
    %c0_157 = arith.constant 0 : index
    %c0_158 = arith.constant 0 : index
    %214 = vector.load %arg3[%c0_156, %c0_157, %c0_158] : memref<25x8x128xf32, #tpu.memory_space<vmem>>, vector<1x8x128xf32>
    %215 = vector.shape_cast %214 : vector<1x8x128xf32> to vector<8x128xf32>
    %216 = arith.mulf %213, %215 : vector<8x128xf32>
    %c0_159 = arith.constant 0 : index
    %c0_160 = arith.constant 0 : index
    %217 = vector.load %arg9[%c0_159, %c0_160] : memref<128x128xf32, #tpu.memory_space<vmem>>, vector<8x128xf32>
    tpu.vector_store %arg9[%c0_159, %c0_160], %216 {strides = array<i32>} : memref<128x128xf32, #tpu.memory_space<vmem>>, vector<8x128xf32>,
    %c8_i32_161 = arith.constant 8 : i32
    %218 = tpu.dynamic_rotate %212 by %c8_i32_161 dim 1 : vector<8x128xf32>, i32 -> vector<8x128xf32>
    %c1_162 = arith.constant 1 : index
    %c0_163 = arith.constant 0 : index
    %c0_164 = arith.constant 0 : index
    %219 = vector.load %arg3[%c1_162, %c0_163, %c0_164] : memref<25x8x128xf32, #tpu.memory_space<vmem>>, vector<1x8x128xf32>
    %220 = vector.shape_cast %219 : vector<1x8x128xf32> to vector<8x128xf32>
    %221 = arith.mulf %218, %220 : vector<8x128xf32>
    %c8_165 = arith.constant 8 : index
    %c0_166 = arith.constant 0 : index
    %222 = vector.load %arg9[%c8_165, %c0_166] : memref<128x128xf32, #tpu.memory_space<vmem>>, vector<8x128xf32>
    tpu.vector_store %arg9[%c8_165, %c0_166], %221 {strides = array<i32>} : memref<128x128xf32, #tpu.memory_space<vmem>>, vector<8x128xf32>,
    %c7_i32_167 = arith.constant 7 : i32
    %223 = tpu.dynamic_rotate %212 by %c7_i32_167 dim 1 : vector<8x128xf32>, i32 -> vector<8x128xf32>
    %c2_168 = arith.constant 2 : index
    %c0_169 = arith.constant 0 : index
    %c0_170 = arith.constant 0 : index
    %224 = vector.load %arg3[%c2_168, %c0_169, %c0_170] : memref<25x8x128xf32, #tpu.memory_space<vmem>>, vector<1x8x128xf32>
    %225 = vector.shape_cast %224 : vector<1x8x128xf32> to vector<8x128xf32>
    %226 = arith.mulf %223, %225 : vector<8x128xf32>
    %c16_171 = arith.constant 16 : index
    %c0_172 = arith.constant 0 : index
    %227 = vector.load %arg9[%c16_171, %c0_172] : memref<128x128xf32, #tpu.memory_space<vmem>>, vector<8x128xf32>
    tpu.vector_store %arg9[%c16_171, %c0_172], %226 {strides = array<i32>} : memref<128x128xf32, #tpu.memory_space<vmem>>, vector<8x128xf32>,
    %c1_i32_173 = arith.constant 1 : i32
    %228 = tpu.dynamic_rotate %212 by %c1_i32_173 dim 1 : vector<8x128xf32>, i32 -> vector<8x128xf32>
    %c3_174 = arith.constant 3 : index
    %c0_175 = arith.constant 0 : index
    %c0_176 = arith.constant 0 : index
    %229 = vector.load %arg3[%c3_174, %c0_175, %c0_176] : memref<25x8x128xf32, #tpu.memory_space<vmem>>, vector<1x8x128xf32>
    %230 = vector.shape_cast %229 : vector<1x8x128xf32> to vector<8x128xf32>
    %231 = arith.mulf %228, %230 : vector<8x128xf32>
    %c24_177 = arith.constant 24 : index
    %c0_178 = arith.constant 0 : index
    %232 = vector.load %arg9[%c24_177, %c0_178] : memref<128x128xf32, #tpu.memory_space<vmem>>, vector<8x128xf32>
    tpu.vector_store %arg9[%c24_177, %c0_178], %231 {strides = array<i32>} : memref<128x128xf32, #tpu.memory_space<vmem>>, vector<8x128xf32>,
    %c4_179 = arith.constant 4 : index
    %c0_180 = arith.constant 0 : index
    %c0_181 = arith.constant 0 : index
    %233 = vector.load %arg3[%c4_179, %c0_180, %c0_181] : memref<25x8x128xf32, #tpu.memory_space<vmem>>, vector<1x8x128xf32>
    %234 = vector.shape_cast %233 : vector<1x8x128xf32> to vector<8x128xf32>
    %235 = arith.mulf %212, %234 : vector<8x128xf32>
    %c32_182 = arith.constant 32 : index
    %c0_183 = arith.constant 0 : index
    %236 = vector.load %arg9[%c32_182, %c0_183] : memref<128x128xf32, #tpu.memory_space<vmem>>, vector<8x128xf32>
    tpu.vector_store %arg9[%c32_182, %c0_183], %235 {strides = array<i32>} : memref<128x128xf32, #tpu.memory_space<vmem>>, vector<8x128xf32>,
    %c127_i32_184 = arith.constant 127 : i32
    %237 = tpu.dynamic_rotate %212 by %c127_i32_184 dim 1 : vector<8x128xf32>, i32 -> vector<8x128xf32>
    %c5_185 = arith.constant 5 : index
    %c0_186 = arith.constant 0 : index
    %c0_187 = arith.constant 0 : index
    %238 = vector.load %arg3[%c5_185, %c0_186, %c0_187] : memref<25x8x128xf32, #tpu.memory_space<vmem>>, vector<1x8x128xf32>
    %239 = vector.shape_cast %238 : vector<1x8x128xf32> to vector<8x128xf32>
    %240 = arith.mulf %237, %239 : vector<8x128xf32>
    %c40_188 = arith.constant 40 : index
    %c0_189 = arith.constant 0 : index
    %241 = vector.load %arg9[%c40_188, %c0_189] : memref<128x128xf32, #tpu.memory_space<vmem>>, vector<8x128xf32>
    tpu.vector_store %arg9[%c40_188, %c0_189], %240 {strides = array<i32>} : memref<128x128xf32, #tpu.memory_space<vmem>>, vector<8x128xf32>,
    %c121_i32_190 = arith.constant 121 : i32
    %242 = tpu.dynamic_rotate %212 by %c121_i32_190 dim 1 : vector<8x128xf32>, i32 -> vector<8x128xf32>
    %c6_191 = arith.constant 6 : index
    %c0_192 = arith.constant 0 : index
    %c0_193 = arith.constant 0 : index
    %243 = vector.load %arg3[%c6_191, %c0_192, %c0_193] : memref<25x8x128xf32, #tpu.memory_space<vmem>>, vector<1x8x128xf32>
    %244 = vector.shape_cast %243 : vector<1x8x128xf32> to vector<8x128xf32>
    %245 = arith.mulf %242, %244 : vector<8x128xf32>
    %c48_194 = arith.constant 48 : index
    %c0_195 = arith.constant 0 : index
    %246 = vector.load %arg9[%c48_194, %c0_195] : memref<128x128xf32, #tpu.memory_space<vmem>>, vector<8x128xf32>
    tpu.vector_store %arg9[%c48_194, %c0_195], %245 {strides = array<i32>} : memref<128x128xf32, #tpu.memory_space<vmem>>, vector<8x128xf32>,
    %c120_i32_196 = arith.constant 120 : i32
    %247 = tpu.dynamic_rotate %212 by %c120_i32_196 dim 1 : vector<8x128xf32>, i32 -> vector<8x128xf32>
    %c7_197 = arith.constant 7 : index
    %c0_198 = arith.constant 0 : index
    %c0_199 = arith.constant 0 : index
    %248 = vector.load %arg3[%c7_197, %c0_198, %c0_199] : memref<25x8x128xf32, #tpu.memory_space<vmem>>, vector<1x8x128xf32>
    %249 = vector.shape_cast %248 : vector<1x8x128xf32> to vector<8x128xf32>
    %250 = arith.mulf %247, %249 : vector<8x128xf32>
    %c56_200 = arith.constant 56 : index
    %c0_201 = arith.constant 0 : index
    %251 = vector.load %arg9[%c56_200, %c0_201] : memref<128x128xf32, #tpu.memory_space<vmem>>, vector<8x128xf32>
    tpu.vector_store %arg9[%c56_200, %c0_201], %250 {strides = array<i32>} : memref<128x128xf32, #tpu.memory_space<vmem>>, vector<8x128xf32>,
    %c119_i32_202 = arith.constant 119 : i32
    %252 = tpu.dynamic_rotate %212 by %c119_i32_202 dim 1 : vector<8x128xf32>, i32 -> vector<8x128xf32>
    %c8_203 = arith.constant 8 : index
    %c0_204 = arith.constant 0 : index
    %c0_205 = arith.constant 0 : index
    %253 = vector.load %arg3[%c8_203, %c0_204, %c0_205] : memref<25x8x128xf32, #tpu.memory_space<vmem>>, vector<1x8x128xf32>
    %254 = vector.shape_cast %253 : vector<1x8x128xf32> to vector<8x128xf32>
    %255 = arith.mulf %252, %254 : vector<8x128xf32>
    %c64_206 = arith.constant 64 : index
    %c0_207 = arith.constant 0 : index
    %256 = vector.load %arg9[%c64_206, %c0_207] : memref<128x128xf32, #tpu.memory_space<vmem>>, vector<8x128xf32>
    tpu.vector_store %arg9[%c64_206, %c0_207], %255 {strides = array<i32>} : memref<128x128xf32, #tpu.memory_space<vmem>>, vector<8x128xf32>,
    %c0_208 = arith.constant 0 : index
    %c0_209 = arith.constant 0 : index
    %257 = vector.load %arg6[%c0_208, %c0_209] : memref<8x128xbf16, #tpu.memory_space<vmem>>, vector<8x128xbf16>
    %c0_210 = arith.constant 0 : index
    %c0_211 = arith.constant 0 : index
    %258 = vector.load %arg9[%c0_210, %c0_211] : memref<128x128xf32, #tpu.memory_space<vmem>>, vector<128x128xf32>
    %259 = arith.truncf %258 : vector<128x128xf32> to vector<128x128xbf16>
    %cst_212 = arith.constant dense<0.000000e+00> : vector<8x128xf32>
    %260 = tpu.matmul %257, %259, %cst_212 {dimension_numbers = #tpu.dot_dimension_numbers<[1], [0], [0], [1], [0, 0, 1, 1], [], []>} : vector<8x128xbf16>, vector<128x128xbf16>, vector<8x128xf32> -> vector<8x128xf32>
    %261 = arith.negf %260 : vector<8x128xf32>
    %262 = math.exp %261 : vector<8x128xf32>
    %cst_213 = arith.constant 1.000000e+00 : f32
    %263 = vector.broadcast %cst_213 : f32 to vector<8x128xf32>
    %264 = arith.addf %263, %262 : vector<8x128xf32>
    %265 = arith.divf %263, %264 : vector<8x128xf32>
    %266 = arith.mulf %206, %265 : vector<8x128xf32>
    %267 = arith.addf %266, %77 : vector<8x128xf32>
    %c0_214 = arith.constant 0 : index
    %c0_215 = arith.constant 0 : index
    %268 = vector.load %arg7[%c0_214, %c0_215] : memref<8x128xf32, #tpu.memory_space<vmem>>, vector<8x128xf32>
    tpu.vector_store %arg7[%c0_214, %c0_215], %267 {strides = array<i32>} : memref<8x128xf32, #tpu.memory_space<vmem>>, vector<8x128xf32>,
    return
  }
  func.func @transform_0(%arg0: i32) -> (i32, i32) {
    %c0_i32 = arith.constant 0 : i32
    %c0_i32_0 = arith.constant 0 : i32
    %c0_i32_1 = arith.constant 0 : i32
    return %c0_i32, %c0_i32_0 : i32, i32
  }
  func.func @transform_1(%arg0: i32) -> (i32, i32) {
    %c0_i32 = arith.constant 0 : i32
    %c0_i32_0 = arith.constant 0 : i32
    %c0_i32_1 = arith.constant 0 : i32
    return %c0_i32, %c0_i32_0 : i32, i32
  }
  func.func @transform_2(%arg0: i32) -> (i32, i32, i32) {
    %c0_i32 = arith.constant 0 : i32
    %c0_i32_0 = arith.constant 0 : i32
    %c0_i32_1 = arith.constant 0 : i32
    %c0_i32_2 = arith.constant 0 : i32
    return %c0_i32, %c0_i32_0, %c0_i32_1 : i32, i32, i32
  }
  func.func @transform_3(%arg0: i32) -> (i32, i32) {
    %c0_i32 = arith.constant 0 : i32
    %c0_i32_0 = arith.constant 0 : i32
    %c0_i32_1 = arith.constant 0 : i32
    return %c0_i32, %c0_i32_0 : i32, i32
  }
  func.func @transform_4(%arg0: i32) -> (i32, i32) {
    %c0_i32 = arith.constant 0 : i32
    %c0_i32_0 = arith.constant 0 : i32
    %c0_i32_1 = arith.constant 0 : i32
    return %c0_i32, %c0_i32_0 : i32, i32
  }
  func.func @transform_5(%arg0: i32) -> (i32, i32) {
    %c0_i32 = arith.constant 0 : i32
    %c0_i32_0 = arith.constant 0 : i32
    %c0_i32_1 = arith.constant 0 : i32
    return %c0_i32, %c0_i32_0 : i32, i32
  }
  func.func @transform_6(%arg0: i32) -> (i32, i32) {
    %c0_i32 = arith.constant 0 : i32
    %c0_i32_0 = arith.constant 0 : i32
    %c0_i32_1 = arith.constant 0 : i32
    return %c0_i32, %c0_i32_0 : i32, i32
  }
}

</mosaic_0001>

<bundles_post_ra>
// kernel: easn_deep_enc_forward.1
= control target key start
LH: loop header
LB: loop body
LE: loop exit
PB: predicated region body
PF: predicated region fallthrough
CT: control target
= control target key end

     0   :  { %v867_v12 = vmov 0.0   ;;  %s870_s17 = smov 1   ;;  %s871_s18 = smov 8   ;;  %vm876_vm1 = vmmov 0   ;;  %v24_v36 = vlaneseq  ;;  %vm877_vm3 = vmmov 1   ;;  %s1192_s0 = inlined_call_operand.vmem [shape: bf16[128,128], index: 0, kind: input, shape index: {}]   ;;  %s1193_s1 = inlined_call_operand.vmem [shape: bf16[24,128], index: 1, kind: input, shape index: {}]   ;;  %s1194_s2 = inlined_call_operand.vmem [shape: f32[25,8,128], index: 2, kind: input, shape index: {}]   ;;  %s1195_s3 = inlined_call_operand.vmem [shape: bf16[8,128], index: 3, kind: input, shape index: {}]   ;;  %s1196_s4 = inlined_call_operand.vmem [shape: bf16[16,256], index: 4, kind: input, shape index: {}]   ;;  %s1197_s5 = inlined_call_operand.vmem [shape: bf16[8,128], index: 5, kind: input, shape index: {}]   ;;  %s1198_s6 = inlined_call_operand.vmem [shape: f32[8,128], index: 6, kind: output, shape index: {}]  }
   0x1   :  { %v846_v0 = vld [vmem:[%s1192_s0] sm:$0xff]   ;;  %v847_v1 = vld [vmem:[%s1192_s0 + $0x8] sm:$0xff]   ;;  %v848_v2 = vld [vmem:[%s1192_s0 + $0x10] sm:$0xff]   ;;  %789 = vmatprep.subr.bf16.mxu1 %v867_v12  ;;  %s872_s19 = smov 121   ;;  %s873_s20 = smov 127   ;;  %799 = vmatprep.mubr.msk.bf16.mxu1 %vm876_vm1, %v867_v12  ;;  %v878_v50 = vmov 1.0  }
   0x2   :  { %769 = vmatprep.subr.bf16.mxu0 %v846_v0  ;;  %v849_v3 = vld [vmem:[%s1192_s0 + $0x18] sm:$0xff]   ;;  %v854_v4 = vld [vmem:[%s1193_s1] sm:$0xff]   ;;  %v851_v6 = vld [vmem:[%s1192_s0 + $0x28] sm:$0xff]   ;;  %s874_s21 = smov 119   ;;  %s875_s22 = smov 120   ;;  %v25_v43 = vshrl.u32 %v24_v36, 7 }
   0x3   :  { %770 = vmatpush3.bf16.msra.mxu0 %v846_v0  ;;  %785 = vmatprep.mubr.bf16.mxu0 %v854_v4  ;;  %v850_v5 = vld [vmem:[%s1192_s0 + $0x20] sm:$0xff]   ;;  %v852_v7 = vld [vmem:[%s1192_s0 + $0x30] sm:$0xff]   ;;  %v853_v8 = vld [vmem:[%s1192_s0 + $0x38] sm:$0xff]   ;;  %s868_s0 = smov 7   ;;  %v879_v60 = vmov 0   ;;  %s881_s25 = smov 18  }
   0x4   :  { %771 = vmatprep.subr.bf16.mxu0 %v847_v1  ;;  %v855_v9 = vld [vmem:[%s1193_s1 + $0x8] ss:$0 sps:$4 sm:$0xff]   ;;  %s869_s1 = smov 9   ;;  %v980_v19 = vld [vmem:[%s1194_s2] sm:$0xff]  ;;  %v990_v21 = vld [vmem:[%s1194_s2 + $0x18] sm:$0xff]  ;;  %vm32_vm2 = vcmp.eq.s32.totalorder %v25_v43, 0 }
   0x5   :  { %v985_v20 = vld [vmem:[%s1194_s2 + $0x8] sm:$0xff]  ;;  %v997_v26 = vld [vmem:[%s1194_s2 + $0x10] sm:$0xff]  ;;  %v1009_v33 = vld [vmem:[%s1194_s2 + $0x20] sm:$0xff]  ;;  %s882_s26 = smov 15   ;;  %s883_s27 = smov 16  }
   0x6   :  { %v1003_v29 = vld [vmem:[%s1194_s2 + $0x28] sm:$0xff]  ;;  %v1016_v37 = vld [vmem:[%s1194_s2 + $0x38] sm:$0xff]  ;;  %v1022_v40 = vld [vmem:[%s1194_s2 + $0x30] sm:$0xff]  ;;  %s884_s28 = smov 10   ;;  %s885_s29 = smov 14  }
   0x7   :  { %772 = vmatpush3.bf16.msra.mxu0 %v847_v1  ;;  %v1029_v44 = vld [vmem:[%s1194_s2 + $0x40] sm:$0xff]  ;;  %vm1035_vm4 = vmpackc.low %vm32_vm2, %vm877_vm3  ;;  %s886_s30 = smov 2   ;;  %s887_s7 = smov 6   ;;  %v715_v43 = vld [vmem:[%s1194_s2 + $0x68] sm:$0xff] }
   0x8   :  { %773 = vmatprep.subr.bf16.mxu0 %v848_v2  ;;  %v246_v52 = vld [vmem:[%s1195_s3] sm:$0xf]  ;;  %s880_s3 = smov 17   ;;  %s888_s8 = smov 122   ;;  %v858_v0 = vld [vmem:[%s1196_s4 + $0x4] ss:$8 sps:$4 sm:$0xff]  }
   0x9   :  { %s889_s9 = smov 126   ;;  %s890_s10 = smov 114  }
   0xa   :  { %s891_s11 = smov 118   ;;  %s892_s12 = smov 112  }
   0xb   :  { %774 = vmatpush3.bf16.msra.mxu0 %v848_v2  ;;  %s893_s13 = smov 113   ;;  %s894_s16 = smov 110  }
   0xc   :  { %775 = vmatprep.subr.bf16.mxu0 %v849_v3  ;;  %s895_s23 = smov 111  }
   0xf   :  { %776 = vmatpush3.bf16.msra.mxu0 %v849_v3 }
  0x10   :  { %777 = vmatprep.subr.bf16.mxu0 %v850_v5 }
  0x13   :  { %778 = vmatpush3.bf16.msra.mxu0 %v850_v5 }
  0x14   :  { %779 = vmatprep.subr.bf16.mxu0 %v851_v6 }
  0x17   :  { %780 = vmatpush3.bf16.msra.mxu0 %v851_v6 }
  0x18   :  { %781 = vmatprep.subr.bf16.mxu0 %v852_v7 }
  0x1b   :  { %782 = vmatpush3.bf16.msra.mxu0 %v852_v7 }
  0x1c   :  { %783 = vmatprep.subr.bf16.mxu0 %v853_v8 }
  0x1f   :  { %784 = vmatpush3.bf16.msra.mxu0 %v853_v8 }
  0x20   :  { %803 = vmatprep.subr.bf16.mxu0 %v867_v12 }
  0x22   :  { %786 = vmatmul.mubr.bf16.vlgmr.msra.gmra.mrb[0].mxu0 %v855_v9 }
  0x23   :  { %813 = vmatprep.mubr.msk.bf16.mxu0 %vm876_vm1, %v867_v12 }
  0xf5   :  { %v961_v10 = vpop.f32.mrb[0].mxu0 }
  0xf6   :  { %v963_v11 = vpop.f32.mrb[1].mxu0 }
  0xf7   :  { %v788_v13 = vpop.f32.mrb[2].mxu0 }
  0xf8   :  { %v181_v14 = vpop.f32.mrb[3].mxu0 }
  0xf9   :  { %vm192_vm0 = vcmp.ge.f32.partialorder %v181_v14, 0.0  ;;  %v193_v15 = vmul.f32 0.01, %v181_v14 }
  0xfb   :  { %v194_v16 = vsel %vm192_vm0, %v181_v14, %v193_v15 }
  0xfc   :  { %206 = vrot.lane.b32.xlu1 %v194_v16, %s868_s0  ;;  %195 = vrot.lane.b32.xlu0 %v194_v16, %s869_s1  ;;  %v220_v39 = vmul.f32 %v1009_v33, %v194_v16 }
 0x100   :  { %212 = vrot.lane.b32.xlu1 %v194_v16, %s870_s17  ;;  %200 = vrot.lane.b32.xlu0 %v194_v16, %s871_s18 }
 0x104   :  { %228 = vrot.lane.b32.xlu1 %v194_v16, %s872_s19  ;;  %222 = vrot.lane.b32.xlu0 %v194_v16, %s873_s20 }
 0x108   :  { %240 = vrot.lane.b32.xlu1 %v194_v16, %s874_s21  ;;  %234 = vrot.lane.b32.xlu0 %v194_v16, %s875_s22 }
 0x16e   :  { %v207_v17 = vpop.permute.xlu1 %206  ;;  %v196_v18 = vpop.permute.xlu0 %195 }
 0x16f   :  { %v198_v24 = vmul.f32 %v980_v19, %v196_v18  ;;  %v210_v31 = vmul.f32 %v997_v26, %v207_v17 }
 0x172   :  { %v213_v22 = vpop.permute.xlu1 %212  ;;  %v201_v23 = vpop.permute.xlu0 %200 }
 0x173   :  { %v204_v25 = vmul.f32 %v985_v20, %v201_v23  ;;  %v216_v27 = vmul.f32 %v990_v21, %v213_v22 }
 0x175   :  { %v263_v28 = vpack.c.bf16 %v204_v25, %v198_v24  ;;  %v264_v34 = vpack.c.bf16 %v216_v27, %v210_v31  ;;  %v711_v24 = vld [vmem:[%s1194_s2 + $0x48] sm:$0xff] }
 0x176   :  { %v223_v30 = vpop.permute.xlu0 %222  ;;  %v229_v32 = vpop.permute.xlu1 %228 }
 0x177   :  { %790 = vmatpush3.bf16.msra.mxu1 %v263_v28  ;;  %v226_v35 = vmul.f32 %v1003_v29, %v223_v30  ;;  %v232_v46 = vmul.f32 %v1022_v40, %v229_v32  ;;  %v712_v32 = vld [vmem:[%s1194_s2 + $0x50] sm:$0xff] }
 0x178   :  { %791 = vmatprep.subr.bf16.mxu1 %v867_v12 }
 0x179   :  { %v265_v41 = vpack.c.bf16 %v226_v35, %v220_v39 }
 0x17a   :  { %v235_v38 = vpop.permute.xlu0 %234  ;;  %v241_v45 = vpop.permute.xlu1 %240 }
 0x17b   :  { %792 = vmatpush3.bf16.msra.mxu1 %v264_v34  ;;  %v238_v42 = vmul.f32 %v1016_v37, %v235_v38  ;;  %v244_v47 = vmul.f32 %v1029_v44, %v241_v45  ;;  %v713_v34 = vld [vmem:[%s1194_s2 + $0x58] sm:$0xff] }
 0x17c   :  { %793 = vmatprep.subr.bf16.mxu1 %v867_v12 }
 0x17d   :  { %v266_v48 = vpack.c.bf16 %v238_v42, %v232_v46  ;;  %v739_v51 = vpack.c.bf16 %v878_v50, %v244_v47  ;;  %v714_v42 = vld [vmem:[%s1194_s2 + $0x60] sm:$0xff] }
 0x17f   :  { %794 = vmatpush3.bf16.msra.mxu1 %v265_v41 }
 0x180   :  { %795 = vmatprep.subr.bf16.mxu1 %v867_v12 }
 0x183   :  { %796 = vmatpush3.bf16.msra.mxu1 %v266_v48 }
 0x184   :  { %797 = vmatprep.subr.bf16.mxu1 %v867_v12 }
 0x187   :  { %798 = vmatpush3.bf16.msk.msra.mxu1 %vm1035_vm4, %v739_v51 }
 0x188   :  { %518 = vmatprep.subr.bf16.mxu1 %v879_v60 }
 0x18a   :  { %800 = vmatmul.mubr.bf16.vlgmr.msra.gmra.mrb[0].mxu1 %v246_v52  ;;  %v716_v52 = vld [vmem:[%s1194_s2 + $0x70] sm:$0xff] }
 0x18b   :  { %550 = vmatprep.mubr.bf16.mxu1 %v858_v0 }
 0x25d   :  { %v305_v53 = vpop.f32.mrb[0].mxu1 }
 0x25e   :  { %v702_v54 = vmul.f32 -1.442695, %v305_v53  ;;  %v801_v55 = vpop.f32.mrb[1].mxu1  ;;  %v717_v53 = vld [vmem:[%s1194_s2 + $0x78] sm:$0xff] }
 0x25f   :  { %v308_v56 = vpop.f32.mrb[2].mxu1 }
 0x260   :  { %859 = vpow2.f32 %v702_v54  ;;  %v802_v57 = vpop.f32.mrb[3].mxu1 }
 0x26a   :  { %v860_v58 = vpop.eup %859 }
 0x26b   :  { %v314_v59 = vadd.f32 1.0, %v860_v58 }
 0x26d   :  { %861 = vrcp.f32 %v314_v59  ;;  %v718_v59 = vld [vmem:[%s1194_s2 + $0x80] sm:$0xff] }
 0x277   :  { %v862_v61 = vpop.eup %861 }
 0x278   :  { %v317_v62 = vmul.f32 %v862_v61, %v963_v11  ;;  %v719_v61 = vld [vmem:[%s1194_s2 + $0x88] sm:$0xff] }
 0x27a   :  { %v1048_v63 = vadd.f32 %v961_v10, %v317_v62 }
 0x27c   :  { %324 = vrot.lane.b32.xlu1 %v1048_v63, %s871_s18  ;;  %319 = vrot.lane.b32.xlu0 %v1048_v63, %s869_s1  ;;  %v340_v14 = vmul.f32 %v1009_v33, %v1048_v63 }
 0x280   :  { %334 = vrot.lane.b32.xlu1 %v1048_v63, %s870_s17  ;;  %329 = vrot.lane.b32.xlu0 %v1048_v63, %s868_s0 }
 0x284   :  { %347 = vrot.lane.b32.xlu1 %v1048_v63, %s872_s19  ;;  %342 = vrot.lane.b32.xlu0 %v1048_v63, %s873_s20 }
 0x288   :  { %357 = vrot.lane.b32.xlu1 %v1048_v63, %s874_s21  ;;  %352 = vrot.lane.b32.xlu0 %v1048_v63, %s875_s22 }
 0x28c   :  { %368 = vrot.lane.b32.xlu1 %v1048_v63, %s880_s3  ;;  %362 = vrot.lane.b32.xlu0 %v1048_v63, %s881_s25 }
 0x290   :  { %380 = vrot.lane.b32.xlu1 %v1048_v63, %s882_s26  ;;  %374 = vrot.lane.b32.xlu0 %v1048_v63, %s883_s27 }
 0x294   :  { %392 = vrot.lane.b32.xlu1 %v1048_v63, %s884_s28  ;;  %386 = vrot.lane.b32.xlu0 %v1048_v63, %s885_s29 }
 0x298   :  { %404 = vrot.lane.b32.xlu1 %v1048_v63, %s886_s30  ;;  %398 = vrot.lane.b32.xlu0 %v1048_v63, %s887_s7 }
 0x29c   :  { %416 = vrot.lane.b32.xlu1 %v1048_v63, %s888_s8  ;;  %410 = vrot.lane.b32.xlu0 %v1048_v63, %s889_s9 }
 0x2a0   :  { %428 = vrot.lane.b32.xlu1 %v1048_v63, %s890_s10  ;;  %422 = vrot.lane.b32.xlu0 %v1048_v63, %s891_s11 }
 0x2a4   :  { %440 = vrot.lane.b32.xlu1 %v1048_v63, %s892_s12  ;;  %434 = vrot.lane.b32.xlu0 %v1048_v63, %s893_s13 }
 0x2a8   :  { %452 = vrot.lane.b32.xlu1 %v1048_v63, %s894_s16  ;;  %446 = vrot.lane.b32.xlu0 %v1048_v63, %s895_s23 }
 0x2ee   :  { %v325_v1 = vpop.permute.xlu1 %324  ;;  %v320_v2 = vpop.permute.xlu0 %319 }
 0x2ef   :  { %v327_v3 = vmul.f32 %v985_v20, %v325_v1  ;;  %v322_v4 = vmul.f32 %v320_v2, %v980_v19 }
 0x2f1   :  { %v492_v5 = vpack.c.bf16 %v327_v3, %v322_v4  ;;  %v720_v4 = vld [vmem:[%s1194_s2 + $0x90] sm:$0xff] }
 0x2f2   :  { %v335_v6 = vpop.permute.xlu1 %334  ;;  %v330_v7 = vpop.permute.xlu0 %329 }
 0x2f3   :  { %v337_v8 = vmul.f32 %v990_v21, %v335_v6  ;;  %v332_v9 = vmul.f32 %v997_v26, %v330_v7  ;;  %519 = vmatpush1.bf16.msra.mxu1 %v492_v5  ;;  %v721_v5 = vld [vmem:[%s1194_s2 + $0x98] sm:$0xff] }
 0x2f4   :  { %520 = vmatprep.subr.bf16.mxu1 %v879_v60 }
 0x2f5   :  { %v493_v10 = vpack.c.bf16 %v337_v8, %v332_v9 }
 0x2f6   :  { %v348_v11 = vpop.permute.xlu1 %347  ;;  %v343_v13 = vpop.permute.xlu0 %342 }
 0x2f7   :  { %v345_v15 = vmul.f32 %v1003_v29, %v343_v13  ;;  %521 = vmatpush1.bf16.msra.mxu1 %v493_v10  ;;  %v350_v22 = vmul.f32 %v1022_v40, %v348_v11  ;;  %v722_v11 = vld [vmem:[%s1194_s2 + $0xa0] sm:$0xff]  ;;  %v723_v13 = vld [vmem:[%s1194_s2 + $0xa8] sm:$0xff] }
 0x2f8   :  { %522 = vmatprep.subr.bf16.mxu1 %v879_v60 }
 0x2f9   :  { %v494_v16 = vpack.c.bf16 %v345_v15, %v340_v14 }
 0x2fa   :  { %v358_v17 = vpop.permute.xlu1 %357  ;;  %v353_v18 = vpop.permute.xlu0 %352 }
 0x2fb   :  { %v355_v23 = vmul.f32 %v1016_v37, %v353_v18  ;;  %523 = vmatpush1.bf16.msra.mxu1 %v494_v16  ;;  %v360_v30 = vmul.f32 %v1029_v44, %v358_v17 }
 0x2fc   :  { %524 = vmatprep.subr.bf16.mxu1 %v879_v60 }
 0x2fd   :  { %v495_v25 = vpack.c.bf16 %v355_v23, %v350_v22  ;;  %v724_v22 = vld [vmem:[%s1194_s2 + $0xb0] sm:$0xff]  ;;  %v725_v23 = vld [vmem:[%s1194_s2 + $0xb8] sm:$0xff] }
 0x2fe   :  { %v369_v27 = vpop.permute.xlu1 %368  ;;  %v363_v28 = vpop.permute.xlu0 %362 }
 0x2ff   :  { %v366_v31 = vmul.f32 %v711_v24, %v363_v28  ;;  %525 = vmatpush1.bf16.msra.mxu1 %v495_v25  ;;  %v372_v39 = vmul.f32 %v712_v32, %v369_v27  ;;  %v726_v25 = vld [vmem:[%s1194_s2 + $0xc0] sm:$0xff] }
 0x300   :  { %526 = vmatprep.subr.bf16.mxu1 %v879_v60 }
 0x301   :  { %v496_v35 = vpack.c.bf16 %v366_v31, %v360_v30 }
 0x302   :  { %v381_v36 = vpop.permute.xlu1 %380  ;;  %v375_v38 = vpop.permute.xlu0 %374 }
 0x303   :  { %v378_v41 = vmul.f32 %v713_v34, %v375_v38  ;;  %527 = vmatpush1.bf16.msra.mxu1 %v496_v35  ;;  %v384_v48 = vmul.f32 %v714_v42, %v381_v36  ;;  %v856_v36 = vld [vmem:[%s1196_s4] ss:$8 sps:$4 sm:$0xff]  }
 0x304   :  { %528 = vmatprep.subr.bf16.mxu1 %v879_v60 }
 0x305   :  { %v497_v45 = vpack.c.bf16 %v378_v41, %v372_v39 }
 0x306   :  { %v393_v46 = vpop.permute.xlu1 %392  ;;  %v387_v47 = vpop.permute.xlu0 %386 }
 0x307   :  { %v390_v51 = vmul.f32 %v715_v43, %v387_v47  ;;  %529 = vmatpush1.bf16.msra.mxu1 %v497_v45  ;;  %v396_v57 = vmul.f32 %v716_v52, %v393_v46 }
 0x308   :  { %530 = vmatprep.subr.bf16.mxu1 %v879_v60 }
 0x309   :  { %v498_v54 = vpack.c.bf16 %v390_v51, %v384_v48 }
 0x30a   :  { %v405_v55 = vpop.permute.xlu1 %404  ;;  %v399_v56 = vpop.permute.xlu0 %398 }
 0x30b   :  { %v402_v58 = vmul.f32 %v717_v53, %v399_v56  ;;  %531 = vmatpush1.bf16.msra.mxu1 %v498_v54  ;;  %v408_v2 = vmul.f32 %v718_v59, %v405_v55 }
 0x30c   :  { %532 = vmatprep.subr.bf16.mxu1 %v879_v60 }
 0x30d   :  { %v499_v62 = vpack.c.bf16 %v402_v58, %v396_v57 }
 0x30e   :  { %v417_v0 = vpop.permute.xlu1 %416  ;;  %v411_v1 = vpop.permute.xlu0 %410 }
 0x30f   :  { %v414_v3 = vmul.f32 %v719_v61, %v411_v1  ;;  %533 = vmatpush1.bf16.msra.mxu1 %v499_v62  ;;  %v420_v9 = vmul.f32 %v720_v4, %v417_v0 }
 0x310   :  { %534 = vmatprep.subr.bf16.mxu1 %v879_v60 }
 0x311   :  { %v500_v6 = vpack.c.bf16 %v414_v3, %v408_v2 }
 0x312   :  { %v429_v7 = vpop.permute.xlu1 %428  ;;  %v423_v8 = vpop.permute.xlu0 %422 }
 0x313   :  { %v426_v10 = vmul.f32 %v721_v5, %v423_v8  ;;  %535 = vmatpush1.bf16.msra.mxu1 %v500_v6  ;;  %v432_v17 = vmul.f32 %v722_v11, %v429_v7 }
 0x314   :  { %536 = vmatprep.subr.bf16.mxu1 %v879_v60 }
 0x315   :  { %v501_v14 = vpack.c.bf16 %v426_v10, %v420_v9 }
 0x316   :  { %v441_v15 = vpop.permute.xlu1 %440  ;;  %v435_v16 = vpop.permute.xlu0 %434 }
 0x317   :  { %v438_v18 = vmul.f32 %v723_v13, %v435_v16  ;;  %537 = vmatpush1.bf16.msra.mxu1 %v501_v14  ;;  %v444_v30 = vmul.f32 %v724_v22, %v441_v15 }
 0x318   :  { %538 = vmatprep.subr.bf16.mxu1 %v879_v60 }
 0x319   :  { %v502_v24 = vpack.c.bf16 %v438_v18, %v432_v17 }
 0x31a   :  { %v453_v27 = vpop.permute.xlu1 %452  ;;  %v447_v28 = vpop.permute.xlu0 %446 }
 0x31b   :  { %v450_v31 = vmul.f32 %v725_v23, %v447_v28  ;;  %539 = vmatpush1.bf16.msra.mxu1 %v502_v24  ;;  %v456_v32 = vmul.f32 %v726_v25, %v453_v27 }
 0x31c   :  { %540 = vmatprep.subr.bf16.mxu1 %v879_v60 }
 0x31d   :  { %v503_v34 = vpack.c.bf16 %v450_v31, %v444_v30  ;;  %v742_v35 = vpack.c.bf16 %v878_v50, %v456_v32 }
 0x31f   :  { %541 = vmatpush1.bf16.msra.mxu1 %v503_v34 }
 0x320   :  { %542 = vmatprep.subr.bf16.mxu1 %v879_v60 }
 0x323   :  { %743 = vmatpush1.bf16.msk.msra.mxu1 %vm1035_vm4, %v742_v35 }
 0x326   :  { %551 = vmatmul.mubr.bf16.vlgmr.msra.gmra.mrb[4].mxu1 %v856_v36 }
 0x3f9   :  { %v552_v38 = vpop.f32.mrb[4].mxu1 }
 0x3fa   :  { %v554_v39 = vpop.f32.mrb[5].mxu1 }
 0x3fb   :  { %v555_v41 = vpop.f32.mrb[6].mxu1 }
 0x3fc   :  { %vm559_vm5 = vcmp.ge.f32.partialorder %v555_v41, 0.0  ;;  %v560_v42 = vmul.f32 0.01, %v555_v41  ;;  %v557_v43 = vpop.f32.mrb[7].mxu1 }
 0x3fe   :  { %v561_v45 = vsel %vm559_vm5, %v555_v41, %v560_v42 }
 0x3ff   :  { %567 = vrot.lane.b32.xlu1 %v561_v45, %s871_s18  ;;  %562 = vrot.lane.b32.xlu0 %v561_v45, %s869_s1  ;;  %v583_v59 = vmul.f32 %v1009_v33, %v561_v45  ;;  %v605_v33 = vld [vmem:[%s1197_s5] sm:$0xf] }
 0x403   :  { %577 = vrot.lane.b32.xlu1 %v561_v45, %s870_s17  ;;  %572 = vrot.lane.b32.xlu0 %v561_v45, %s868_s0 }
 0x407   :  { %590 = vrot.lane.b32.xlu1 %v561_v45, %s872_s19  ;;  %585 = vrot.lane.b32.xlu0 %v561_v45, %s873_s20 }
 0x40b   :  { %600 = vrot.lane.b32.xlu1 %v561_v45, %s874_s21  ;;  %595 = vrot.lane.b32.xlu0 %v561_v45, %s875_s22 }
 0x471   :  { %v568_v60 = vpop.permute.xlu1 %567  ;;  %v563_v46 = vpop.permute.xlu0 %562 }
 0x472   :  { %v570_v47 = vmul.f32 %v985_v20, %v568_v60  ;;  %v565_v48 = vmul.f32 %v563_v46, %v980_v19 }
 0x474   :  { %v622_v51 = vpack.c.bf16 %v570_v47, %v565_v48 }
 0x475   :  { %v578_v52 = vpop.permute.xlu1 %577  ;;  %v573_v53 = vpop.permute.xlu0 %572 }
 0x476   :  { %v580_v54 = vmul.f32 %v990_v21, %v578_v52  ;;  %v575_v55 = vmul.f32 %v997_v26, %v573_v53  ;;  %804 = vmatpush3.bf16.msra.mxu0 %v622_v51 }
 0x477   :  { %805 = vmatprep.subr.bf16.mxu0 %v867_v12 }
 0x478   :  { %v623_v56 = vpack.c.bf16 %v580_v54, %v575_v55 }
 0x479   :  { %v591_v57 = vpop.permute.xlu1 %590  ;;  %v586_v58 = vpop.permute.xlu0 %585 }
 0x47a   :  { %v588_v61 = vmul.f32 %v1003_v29, %v586_v58  ;;  %806 = vmatpush3.bf16.msra.mxu0 %v623_v56  ;;  %v593_v21 = vmul.f32 %v1022_v40, %v591_v57 }
 0x47b   :  { %807 = vmatprep.subr.bf16.mxu0 %v867_v12 }
 0x47c   :  { %v624_v19 = vpack.c.bf16 %v588_v61, %v583_v59 }
 0x47d   :  { %v601_v20 = vpop.permute.xlu1 %600  ;;  %v596_v62 = vpop.permute.xlu0 %595 }
 0x47e   :  { %v598_v26 = vmul.f32 %v1016_v37, %v596_v62  ;;  %808 = vmatpush3.bf16.msra.mxu0 %v624_v19  ;;  %v603_v0 = vmul.f32 %v1029_v44, %v601_v20 }
 0x47f   :  { %809 = vmatprep.subr.bf16.mxu0 %v867_v12 }
 0x480   :  { %v625_v1 = vpack.c.bf16 %v598_v26, %v593_v21  ;;  %v745_v29 = vpack.c.bf16 %v878_v50, %v603_v0 }
 0x482   :  { %810 = vmatpush3.bf16.msra.mxu0 %v625_v1 }
 0x483   :  { %811 = vmatprep.subr.bf16.mxu0 %v867_v12 }
 0x486   :  { %812 = vmatpush3.bf16.msk.msra.mxu0 %vm1035_vm4, %v745_v29 }
 0x489   :  { %814 = vmatmul.mubr.bf16.vlgmr.msra.gmra.mrb[4].mxu0 %v605_v33 }
 0x55c   :  { %v664_v37 = vpop.f32.mrb[4].mxu0 }
 0x55d   :  { %v737_v40 = vmul.f32 -1.442695, %v664_v37  ;;  %v815_v2 = vpop.f32.mrb[5].mxu0 }
 0x55e   :  { %v667_v3 = vpop.f32.mrb[6].mxu0 }
 0x55f   :  { %863 = vpow2.f32 %v737_v40  ;;  %v816_v44 = vpop.f32.mrb[7].mxu0 }
 0x569   :  { %v864_v4 = vpop.eup %863 }
 0x56a   :  { %v673_v5 = vadd.f32 1.0, %v864_v4 }
 0x56c   :  { %865 = vrcp.f32 %v673_v5 }
 0x576   :  { %v866_v12 = vpop.eup %865 }
 0x577   :  { %v676_v6 = vmul.f32 %v866_v12, %v552_v38 }
 0x579   :  { %v677_v50 = vadd.f32 %v676_v6, %v1048_v63 }
 0x57b   :  { %678 = vst [vmem:[%s1198_s6] sm:$0xff] %v677_v50 }

</bundles_post_ra>
